<compile_context>
chip_gen: v7x
topology: tpu7x:2x2x1
jax: 0.10.0
libtpu: 0.0.40
codegen_flags: <defaults>
</compile_context>

<pallas_src>
import jax
import jax.numpy as jnp
from jax.experimental import pallas as pl
from jax.experimental.pallas import tpu as pltpu


def rnn_kernel(x_ref, len_ref, wih_ref, whh_ref, blstm_ref,
               w1_ref, b1_ref, w2_ref, b2_ref, out_ref):
    T, TB, E = x_ref.shape
    HP = whh_ref.shape[0]            # padded hidden (128) -> lane-aligned gates

    lens = len_ref[...]              # (TB, 1) int32
    whh = whh_ref[...]               # (HP, 4*HP) bf16 (loop-invariant RHS)

    # ---- hoisted input projection: ONE (T*TB, E) x (E, 4*HP) matmul + bias ----
    # Contract over E directly on the 3-D block (no in-kernel reshape/relayout);
    # per-step gates are then a cheap leading-axis index xg[t].
    x_bf16 = x_ref[...].astype(jnp.bfloat16)                            # (T, TB, E)
    xg = jax.lax.dot_general(
        x_bf16, wih_ref[...],
        dimension_numbers=(((2,), (0,)), ((), ())),
        preferred_element_type=jnp.float32) + blstm_ref[...]            # (T, TB, 4HP) f32

    # ---- hoisted per-step validity masks (pack_padded_sequence semantics) ----
    valids = [lens > t for t in range(T)]                               # (TB, 1) bool each

    h = jnp.zeros((TB, HP), jnp.float32)
    c = jnp.zeros((TB, HP), jnp.float32)

    # ---- recurrence, fully unrolled: only h @ W_hh + elementwise on the chain ----
    for t in range(T):
        gates = xg[t] + jnp.dot(h.astype(jnp.bfloat16), whh,
                                preferred_element_type=jnp.float32)     # (TB, 4HP)
        # lane-aligned gate slices (each gate a full 128-lane block), torch order [i,f,g,o]
        i = jax.nn.sigmoid(gates[:, 0 * HP:1 * HP])
        f = jax.nn.sigmoid(gates[:, 1 * HP:2 * HP])
        g = jnp.tanh(gates[:, 2 * HP:3 * HP])
        o = jax.nn.sigmoid(gates[:, 3 * HP:4 * HP])
        c_new = f * c + i * g
        h_new = o * jnp.tanh(c_new)
        v = valids[t]
        c = jnp.where(v, c_new, c)
        h = jnp.where(v, h_new, h)

    # ---- MLP epilogue: fc1 -> relu; fc2 folded into VPU mul + XLU lane reduce ----
    z1 = jnp.dot(h.astype(jnp.bfloat16), w1_ref[...],
                 preferred_element_type=jnp.float32) + b1_ref[...]      # (TB, 128)
    z1 = jnp.maximum(z1, 0.0)
    z2 = jnp.sum(z1 * w2_ref[...], axis=-1, keepdims=True) + b2_ref[...]  # (TB, 1)
    # lane-dense output slab; column 0 is the real result (sliced in wrapper)
    out_ref[...] = jnp.broadcast_to(jax.nn.sigmoid(z2), (TB, out_ref.shape[-1]))


def init_params(key, vocab_size, embed_dim, rnn_hidden, fc_hidden,
                h_pad=128, fc_pad=128):
    ks = jax.random.split(key, 9)
    kH = 1.0 / jnp.sqrt(rnn_hidden)   # PyTorch bound for LSTM and fc1 (in_features = H)
    kF = 1.0 / jnp.sqrt(fc_hidden)    # fc2 bound (in_features = FC)

    emb = jax.random.normal(ks[0], (vocab_size, embed_dim), jnp.float32) * 0.1
    emb = emb.at[0].set(0.0)          # padding_idx = 0

    w_ih = jax.random.uniform(ks[1], (4 * rnn_hidden, embed_dim), jnp.float32, -kH, kH)
    w_hh = jax.random.uniform(ks[2], (4 * rnn_hidden, rnn_hidden), jnp.float32, -kH, kH)
    b_ih = jax.random.uniform(ks[3], (4 * rnn_hidden,), jnp.float32, -kH, kH)
    b_hh = jax.random.uniform(ks[4], (4 * rnn_hidden,), jnp.float32, -kH, kH)

    w1 = jax.random.uniform(ks[5], (fc_hidden, rnn_hidden), jnp.float32, -kH, kH)
    b1 = jax.random.uniform(ks[6], (fc_hidden,), jnp.float32, -kH, kH)
    w2 = jax.random.uniform(ks[7], (1, fc_hidden), jnp.float32, -kF, kF)
    b2 = jax.random.uniform(ks[8], (1,), jnp.float32, -kF, kF)

    H, FC, E = rnn_hidden, fc_hidden, embed_dim
    wih_t = w_ih.T                       # (E, 4H)
    whh_t = w_hh.T                       # (H, 4H)
    b_lstm = b_ih + b_hh                 # (4H,)

    # ---- pad each gate to its own 128-lane block: (.., 4H) -> (.., 4*h_pad) ----
    wih_p = jnp.zeros((E, 4 * h_pad), jnp.float32)
    whh_p = jnp.zeros((h_pad, 4 * h_pad), jnp.float32)
    b_p = jnp.zeros((1, 4 * h_pad), jnp.float32)
    for g in range(4):
        wih_p = wih_p.at[:, g * h_pad:g * h_pad + H].set(wih_t[:, g * H:(g + 1) * H])
        whh_p = whh_p.at[:H, g * h_pad:g * h_pad + H].set(whh_t[:, g * H:(g + 1) * H])
        b_p = b_p.at[0, g * h_pad:g * h_pad + H].set(b_lstm[g * H:(g + 1) * H])

    w1_p = jnp.zeros((h_pad, fc_pad), jnp.float32).at[:H, :FC].set(w1.T)
    b1_p = jnp.zeros((1, fc_pad), jnp.float32).at[0, :FC].set(b1)
    w2_p = jnp.zeros((1, fc_pad), jnp.float32).at[0, :FC].set(w2[0])
    b2_p = b2.reshape(1, 1)

    return {
        "embedding": emb,
        # unpadded f32 params (used only by the pure-JAX reference)
        "w_ih_t": wih_t, "w_hh_t": whh_t, "b_lstm": b_lstm.reshape(1, 4 * H),
        "w1_t": w1.T, "b1": b1.reshape(1, FC), "w2_t": w2.T, "b2": b2.reshape(1, 1),
        # padded kernel params; MXU operands stored in bf16
        "w_ih_p": wih_p.astype(jnp.bfloat16),
        "w_hh_p": whh_p.astype(jnp.bfloat16),
        "b_lstm_p": b_p,
        "w1_p": w1_p.astype(jnp.bfloat16),
        "b1_p": b1_p,
        "w2_p": w2_p,
        "b2_p": b2_p,
    }


def rnn_forward(text, lengths, params, tile_b=8):
    # glue: embedding gather (XLA) + time-major transpose
    emb = params["embedding"][text]                # (B, T, E) f32
    x = jnp.transpose(emb, (1, 0, 2))              # (T, B, E)
    B, T = text.shape
    E = x.shape[-1]
    assert B % tile_b == 0
    lens2 = lengths.astype(jnp.int32).reshape(B, 1)
    HP = params["w_hh_p"].shape[0]
    nb = B // tile_b

    grid_spec = pltpu.PrefetchScalarGridSpec(
        num_scalar_prefetch=0,
        grid=(nb,),
        in_specs=[
            pl.BlockSpec((T, tile_b, E), lambda i: (0, i, 0)),          # x (batch-tiled)
            pl.BlockSpec((tile_b, 1), lambda i: (i, 0)),                # lengths
            pl.BlockSpec(params["w_ih_p"].shape, lambda i: (0, 0)),     # weights: constant
            pl.BlockSpec(params["w_hh_p"].shape, lambda i: (0, 0)),     # index_map -> DMA'd
            pl.BlockSpec(params["b_lstm_p"].shape, lambda i: (0, 0)),   # once, reused
            pl.BlockSpec(params["w1_p"].shape, lambda i: (0, 0)),
            pl.BlockSpec(params["b1_p"].shape, lambda i: (0, 0)),
            pl.BlockSpec(params["w2_p"].shape, lambda i: (0, 0)),
            pl.BlockSpec(params["b2_p"].shape, lambda i: (0, 0)),
        ],
        out_specs=pl.BlockSpec((tile_b, HP), lambda i: (i, 0)),
    )

    out = pl.pallas_call(
        rnn_kernel,
        out_shape=jax.ShapeDtypeStruct((B, HP), jnp.float32),  # lane-dense slab
        grid_spec=grid_spec,
        compiler_params=pltpu.CompilerParams(
            dimension_semantics=("parallel",),   # batch tiles shard across TCs (v7x)
        ),
    )(x, lens2,
      params["w_ih_p"], params["w_hh_p"], params["b_lstm_p"],
      params["w1_p"], params["b1_p"], params["w2_p"], params["b2_p"])
    return out[:, :1]


def rnn_reference(text, lengths, params):
    """Pure-JAX f32 reference (unpadded weights): packed-LSTM last hidden + MLP."""
    emb = params["embedding"][text]               # (B, T, E)
    B, T, _ = emb.shape
    H = params["w_hh_t"].shape[0]
    h = jnp.zeros((B, H), jnp.float32)
    c = jnp.zeros((B, H), jnp.float32)
    lens = lengths.astype(jnp.int32).reshape(B, 1)
    for t in range(T):
        x_t = emb[:, t, :]
        gates = x_t @ params["w_ih_t"] + h @ params["w_hh_t"] + params["b_lstm"]
        i = jax.nn.sigmoid(gates[:, 0 * H:1 * H])
        f = jax.nn.sigmoid(gates[:, 1 * H:2 * H])
        g = jnp.tanh(gates[:, 2 * H:3 * H])
        o = jax.nn.sigmoid(gates[:, 3 * H:4 * H])
        c_new = f * c + i * g
        h_new = o * jnp.tanh(c_new)
        valid = t < lens
        c = jnp.where(valid, c_new, c)
        h = jnp.where(valid, h_new, h)
    z1 = jnp.maximum(h @ params["w1_t"] + params["b1"], 0.0)
    return jax.nn.sigmoid(z1 @ params["w2_t"] + params["b2"])


if __name__ == "__main__":
    vocab_size = 50
    embed_dim = 20
    rnn_hidden_size = 64
    fc_hidden_size = 64
    B, T = 16, 8
    TILE_B = 8

    key = jax.random.PRNGKey(0)
    k_par, k_tok, k_len = jax.random.split(key, 3)
    params = init_params(k_par, vocab_size, embed_dim, rnn_hidden_size, fc_hidden_size)

    lengths = jax.random.randint(k_len, (B,), 1, T + 1, dtype=jnp.int32)
    tokens = jax.random.randint(k_tok, (B, T), 1, vocab_size, dtype=jnp.int32)
    pos = jnp.arange(T, dtype=jnp.int32)[None, :]
    text = jnp.where(pos < lengths[:, None], tokens, 0)   # pad with padding_idx=0

    out = rnn_forward(text, lengths, params, tile_b=TILE_B)
    out = jax.block_until_ready(out)

    ref = rnn_reference(text, lengths, params)
    assert out.shape == (B, 1)
    assert bool(jnp.all(jnp.isfinite(out)))
    # delta vs. f32 reference comes only from bf16 MXU operands
    assert bool(jnp.allclose(out, ref, atol=2e-2)), float(jnp.max(jnp.abs(out - ref)))

    print("KERNEL_OK")
</pallas_src>

<mosaic_0001>
module attributes {stable_mosaic.version = 11 : i64} {
  func.func @rnn_kernel(%arg0: i32, %arg1: memref<8x8x20xf32, #tpu.memory_space<vmem>>, %arg2: memref<8x1xi32, #tpu.memory_space<vmem>>, %arg3: memref<20x512xbf16, #tpu.memory_space<vmem>>, %arg4: memref<128x512xbf16, #tpu.memory_space<vmem>>, %arg5: memref<1x512xf32, #tpu.memory_space<vmem>>, %arg6: memref<128x128xbf16, #tpu.memory_space<vmem>>, %arg7: memref<1x128xf32, #tpu.memory_space<vmem>>, %arg8: memref<1x128xf32, #tpu.memory_space<vmem>>, %arg9: memref<1x1xf32, #tpu.memory_space<vmem>>, %arg10: memref<8x128xf32, #tpu.memory_space<vmem>>) attributes {dimension_semantics = [#tpu.dimension_semantics<parallel>], iteration_bounds = array<i64: 2>, scalar_prefetch = 0 : i64, scratch_operands = 0 : i64, tpu.core_type = #tpu.core_type<tc>, window_params = [{transform_indices = @transform_0, window_bounds = array<i64: 8, 8, 20>}, {transform_indices = @transform_1, window_bounds = array<i64: 8, 1>}, {pipeline_mode = #tpu.pipeline_mode<synchronous>, transform_indices = @transform_2, window_bounds = array<i64: 20, 512>}, {pipeline_mode = #tpu.pipeline_mode<synchronous>, transform_indices = @transform_3, window_bounds = array<i64: 128, 512>}, {pipeline_mode = #tpu.pipeline_mode<synchronous>, transform_indices = @transform_4, window_bounds = array<i64: 1, 512>}, {pipeline_mode = #tpu.pipeline_mode<synchronous>, transform_indices = @transform_5, window_bounds = array<i64: 128, 128>}, {pipeline_mode = #tpu.pipeline_mode<synchronous>, transform_indices = @transform_6, window_bounds = array<i64: 1, 128>}, {pipeline_mode = #tpu.pipeline_mode<synchronous>, transform_indices = @transform_7, window_bounds = array<i64: 1, 128>}, {pipeline_mode = #tpu.pipeline_mode<synchronous>, transform_indices = @transform_8, window_bounds = array<i64: 1, 1>}, {transform_indices = @transform_9, window_bounds = array<i64: 8, 128>}]} {
    %c0 = arith.constant 0 : index
    %c0_0 = arith.constant 0 : index
    %0 = vector.load %arg2[%c0, %c0_0] : memref<8x1xi32, #tpu.memory_space<vmem>>, vector<8x1xi32>
    %c0_1 = arith.constant 0 : index
    %c0_2 = arith.constant 0 : index
    %1 = vector.load %arg4[%c0_1, %c0_2] : memref<128x512xbf16, #tpu.memory_space<vmem>>, vector<128x512xbf16>
    %c0_3 = arith.constant 0 : index
    %c0_4 = arith.constant 0 : index
    %c0_5 = arith.constant 0 : index
    %2 = vector.load %arg1[%c0_3, %c0_4, %c0_5] : memref<8x8x20xf32, #tpu.memory_space<vmem>>, vector<8x8x20xf32>
    %3 = arith.truncf %2 : vector<8x8x20xf32> to vector<8x8x20xbf16>
    %c0_6 = arith.constant 0 : index
    %c0_7 = arith.constant 0 : index
    %4 = vector.load %arg3[%c0_6, %c0_7] : memref<20x512xbf16, #tpu.memory_space<vmem>>, vector<20x512xbf16>
    %cst = arith.constant dense<0.000000e+00> : vector<8x8x512xf32>
    %5 = tpu.matmul %3, %4, %cst {dimension_numbers = #tpu.dot_dimension_numbers<[2], [0], [0, 1], [1], [0, 0, 0, 1, 1, 1], [], []>} : vector<8x8x20xbf16>, vector<20x512xbf16>, vector<8x8x512xf32> -> vector<8x8x512xf32>
    %c0_8 = arith.constant 0 : index
    %c0_9 = arith.constant 0 : index
    %6 = vector.load %arg5[%c0_8, %c0_9] : memref<1x512xf32, #tpu.memory_space<vmem>>, vector<1x512xf32>
    %7 = vector.shape_cast %6 : vector<1x512xf32> to vector<1x1x512xf32>
    %8 = vector.broadcast %7 : vector<1x1x512xf32> to vector<8x8x512xf32>
    %9 = arith.addf %5, %8 : vector<8x8x512xf32>
    %c0_i32 = arith.constant 0 : i32
    %10 = vector.broadcast %c0_i32 : i32 to vector<8x1xi32>
    %11 = arith.cmpi sgt, %0, %10 : vector<8x1xi32>
    %c1_i32 = arith.constant 1 : i32
    %12 = vector.broadcast %c1_i32 : i32 to vector<8x1xi32>
    %13 = arith.cmpi sgt, %0, %12 : vector<8x1xi32>
    %c2_i32 = arith.constant 2 : i32
    %14 = vector.broadcast %c2_i32 : i32 to vector<8x1xi32>
    %15 = arith.cmpi sgt, %0, %14 : vector<8x1xi32>
    %c3_i32 = arith.constant 3 : i32
    %16 = vector.broadcast %c3_i32 : i32 to vector<8x1xi32>
    %17 = arith.cmpi sgt, %0, %16 : vector<8x1xi32>
    %c4_i32 = arith.constant 4 : i32
    %18 = vector.broadcast %c4_i32 : i32 to vector<8x1xi32>
    %19 = arith.cmpi sgt, %0, %18 : vector<8x1xi32>
    %c5_i32 = arith.constant 5 : i32
    %20 = vector.broadcast %c5_i32 : i32 to vector<8x1xi32>
    %21 = arith.cmpi sgt, %0, %20 : vector<8x1xi32>
    %c6_i32 = arith.constant 6 : i32
    %22 = vector.broadcast %c6_i32 : i32 to vector<8x1xi32>
    %23 = arith.cmpi sgt, %0, %22 : vector<8x1xi32>
    %c7_i32 = arith.constant 7 : i32
    %24 = vector.broadcast %c7_i32 : i32 to vector<8x1xi32>
    %25 = arith.cmpi sgt, %0, %24 : vector<8x1xi32>
    %cst_10 = arith.constant 0.000000e+00 : f32
    %26 = vector.broadcast %cst_10 : f32 to vector<8x128xf32>
    %cst_11 = arith.constant 0.000000e+00 : f32
    %27 = vector.broadcast %cst_11 : f32 to vector<8x128xf32>
    %28 = vector.extract_strided_slice %9 {offsets = [0, 0, 0], sizes = [1, 8, 512], strides = [1, 1, 1]} : vector<8x8x512xf32> to vector<1x8x512xf32>
    %29 = vector.shape_cast %28 : vector<1x8x512xf32> to vector<8x512xf32>
    %30 = arith.truncf %26 : vector<8x128xf32> to vector<8x128xbf16>
    %cst_12 = arith.constant dense<0.000000e+00> : vector<8x512xf32>
    %31 = tpu.matmul %30, %1, %cst_12 {dimension_numbers = #tpu.dot_dimension_numbers<[1], [0], [0], [1], [0, 0, 1, 1], [], []>} : vector<8x128xbf16>, vector<128x512xbf16>, vector<8x512xf32> -> vector<8x512xf32>
    %32 = arith.addf %29, %31 : vector<8x512xf32>
    %33 = vector.extract_strided_slice %32 {offsets = [0, 0], sizes = [8, 128], strides = [1, 1]} : vector<8x512xf32> to vector<8x128xf32>
    %34 = arith.negf %33 : vector<8x128xf32>
    %35 = math.exp %34 : vector<8x128xf32>
    %cst_13 = arith.constant 1.000000e+00 : f32
    %36 = vector.broadcast %cst_13 : f32 to vector<8x128xf32>
    %37 = arith.addf %36, %35 : vector<8x128xf32>
    %38 = arith.divf %36, %37 : vector<8x128xf32>
    %39 = vector.extract_strided_slice %32 {offsets = [0, 128], sizes = [8, 128], strides = [1, 1]} : vector<8x512xf32> to vector<8x128xf32>
    %40 = arith.negf %39 : vector<8x128xf32>
    %41 = math.exp %40 : vector<8x128xf32>
    %cst_14 = arith.constant 1.000000e+00 : f32
    %42 = vector.broadcast %cst_14 : f32 to vector<8x128xf32>
    %43 = arith.addf %42, %41 : vector<8x128xf32>
    %44 = arith.divf %42, %43 : vector<8x128xf32>
    %45 = vector.extract_strided_slice %32 {offsets = [0, 256], sizes = [8, 128], strides = [1, 1]} : vector<8x512xf32> to vector<8x128xf32>
    %46 = math.tanh %45 : vector<8x128xf32>
    %47 = vector.extract_strided_slice %32 {offsets = [0, 384], sizes = [8, 128], strides = [1, 1]} : vector<8x512xf32> to vector<8x128xf32>
    %48 = arith.negf %47 : vector<8x128xf32>
    %49 = math.exp %48 : vector<8x128xf32>
    %cst_15 = arith.constant 1.000000e+00 : f32
    %50 = vector.broadcast %cst_15 : f32 to vector<8x128xf32>
    %51 = arith.addf %50, %49 : vector<8x128xf32>
    %52 = arith.divf %50, %51 : vector<8x128xf32>
    %53 = arith.mulf %44, %27 : vector<8x128xf32>
    %54 = arith.mulf %38, %46 : vector<8x128xf32>
    %55 = arith.addf %53, %54 : vector<8x128xf32>
    %56 = math.tanh %55 : vector<8x128xf32>
    %57 = arith.mulf %52, %56 : vector<8x128xf32>
    %58 = vector.shape_cast %11 : vector<8x1xi1> to vector<8x1xi1>
    %59 = vector.broadcast %58 : vector<8x1xi1> to vector<8x128xi1>
    %60 = arith.select %59, %55, %27 : vector<8x128xi1>, vector<8x128xf32>
    %61 = vector.shape_cast %11 : vector<8x1xi1> to vector<8x1xi1>
    %62 = vector.broadcast %61 : vector<8x1xi1> to vector<8x128xi1>
    %63 = arith.select %62, %57, %26 : vector<8x128xi1>, vector<8x128xf32>
    %64 = vector.extract_strided_slice %9 {offsets = [1, 0, 0], sizes = [1, 8, 512], strides = [1, 1, 1]} : vector<8x8x512xf32> to vector<1x8x512xf32>
    %65 = vector.shape_cast %64 : vector<1x8x512xf32> to vector<8x512xf32>
    %66 = arith.truncf %63 : vector<8x128xf32> to vector<8x128xbf16>
    %cst_16 = arith.constant dense<0.000000e+00> : vector<8x512xf32>
    %67 = tpu.matmul %66, %1, %cst_16 {dimension_numbers = #tpu.dot_dimension_numbers<[1], [0], [0], [1], [0, 0, 1, 1], [], []>} : vector<8x128xbf16>, vector<128x512xbf16>, vector<8x512xf32> -> vector<8x512xf32>
    %68 = arith.addf %65, %67 : vector<8x512xf32>
    %69 = vector.extract_strided_slice %68 {offsets = [0, 0], sizes = [8, 128], strides = [1, 1]} : vector<8x512xf32> to vector<8x128xf32>
    %70 = arith.negf %69 : vector<8x128xf32>
    %71 = math.exp %70 : vector<8x128xf32>
    %cst_17 = arith.constant 1.000000e+00 : f32
    %72 = vector.broadcast %cst_17 : f32 to vector<8x128xf32>
    %73 = arith.addf %72, %71 : vector<8x128xf32>
    %74 = arith.divf %72, %73 : vector<8x128xf32>
    %75 = vector.extract_strided_slice %68 {offsets = [0, 128], sizes = [8, 128], strides = [1, 1]} : vector<8x512xf32> to vector<8x128xf32>
    %76 = arith.negf %75 : vector<8x128xf32>
    %77 = math.exp %76 : vector<8x128xf32>
    %cst_18 = arith.constant 1.000000e+00 : f32
    %78 = vector.broadcast %cst_18 : f32 to vector<8x128xf32>
    %79 = arith.addf %78, %77 : vector<8x128xf32>
    %80 = arith.divf %78, %79 : vector<8x128xf32>
    %81 = vector.extract_strided_slice %68 {offsets = [0, 256], sizes = [8, 128], strides = [1, 1]} : vector<8x512xf32> to vector<8x128xf32>
    %82 = math.tanh %81 : vector<8x128xf32>
    %83 = vector.extract_strided_slice %68 {offsets = [0, 384], sizes = [8, 128], strides = [1, 1]} : vector<8x512xf32> to vector<8x128xf32>
    %84 = arith.negf %83 : vector<8x128xf32>
    %85 = math.exp %84 : vector<8x128xf32>
    %cst_19 = arith.constant 1.000000e+00 : f32
    %86 = vector.broadcast %cst_19 : f32 to vector<8x128xf32>
    %87 = arith.addf %86, %85 : vector<8x128xf32>
    %88 = arith.divf %86, %87 : vector<8x128xf32>
    %89 = arith.mulf %80, %60 : vector<8x128xf32>
    %90 = arith.mulf %74, %82 : vector<8x128xf32>
    %91 = arith.addf %89, %90 : vector<8x128xf32>
    %92 = math.tanh %91 : vector<8x128xf32>
    %93 = arith.mulf %88, %92 : vector<8x128xf32>
    %94 = vector.shape_cast %13 : vector<8x1xi1> to vector<8x1xi1>
    %95 = vector.broadcast %94 : vector<8x1xi1> to vector<8x128xi1>
    %96 = arith.select %95, %91, %60 : vector<8x128xi1>, vector<8x128xf32>
    %97 = vector.shape_cast %13 : vector<8x1xi1> to vector<8x1xi1>
    %98 = vector.broadcast %97 : vector<8x1xi1> to vector<8x128xi1>
    %99 = arith.select %98, %93, %63 : vector<8x128xi1>, vector<8x128xf32>
    %100 = vector.extract_strided_slice %9 {offsets = [2, 0, 0], sizes = [1, 8, 512], strides = [1, 1, 1]} : vector<8x8x512xf32> to vector<1x8x512xf32>
    %101 = vector.shape_cast %100 : vector<1x8x512xf32> to vector<8x512xf32>
    %102 = arith.truncf %99 : vector<8x128xf32> to vector<8x128xbf16>
    %cst_20 = arith.constant dense<0.000000e+00> : vector<8x512xf32>
    %103 = tpu.matmul %102, %1, %cst_20 {dimension_numbers = #tpu.dot_dimension_numbers<[1], [0], [0], [1], [0, 0, 1, 1], [], []>} : vector<8x128xbf16>, vector<128x512xbf16>, vector<8x512xf32> -> vector<8x512xf32>
    %104 = arith.addf %101, %103 : vector<8x512xf32>
    %105 = vector.extract_strided_slice %104 {offsets = [0, 0], sizes = [8, 128], strides = [1, 1]} : vector<8x512xf32> to vector<8x128xf32>
    %106 = arith.negf %105 : vector<8x128xf32>
    %107 = math.exp %106 : vector<8x128xf32>
    %cst_21 = arith.constant 1.000000e+00 : f32
    %108 = vector.broadcast %cst_21 : f32 to vector<8x128xf32>
    %109 = arith.addf %108, %107 : vector<8x128xf32>
    %110 = arith.divf %108, %109 : vector<8x128xf32>
    %111 = vector.extract_strided_slice %104 {offsets = [0, 128], sizes = [8, 128], strides = [1, 1]} : vector<8x512xf32> to vector<8x128xf32>
    %112 = arith.negf %111 : vector<8x128xf32>
    %113 = math.exp %112 : vector<8x128xf32>
    %cst_22 = arith.constant 1.000000e+00 : f32
    %114 = vector.broadcast %cst_22 : f32 to vector<8x128xf32>
    %115 = arith.addf %114, %113 : vector<8x128xf32>
    %116 = arith.divf %114, %115 : vector<8x128xf32>
    %117 = vector.extract_strided_slice %104 {offsets = [0, 256], sizes = [8, 128], strides = [1, 1]} : vector<8x512xf32> to vector<8x128xf32>
    %118 = math.tanh %117 : vector<8x128xf32>
    %119 = vector.extract_strided_slice %104 {offsets = [0, 384], sizes = [8, 128], strides = [1, 1]} : vector<8x512xf32> to vector<8x128xf32>
    %120 = arith.negf %119 : vector<8x128xf32>
    %121 = math.exp %120 : vector<8x128xf32>
    %cst_23 = arith.constant 1.000000e+00 : f32
    %122 = vector.broadcast %cst_23 : f32 to vector<8x128xf32>
    %123 = arith.addf %122, %121 : vector<8x128xf32>
    %124 = arith.divf %122, %123 : vector<8x128xf32>
    %125 = arith.mulf %116, %96 : vector<8x128xf32>
    %126 = arith.mulf %110, %118 : vector<8x128xf32>
    %127 = arith.addf %125, %126 : vector<8x128xf32>
    %128 = math.tanh %127 : vector<8x128xf32>
    %129 = arith.mulf %124, %128 : vector<8x128xf32>
    %130 = vector.shape_cast %15 : vector<8x1xi1> to vector<8x1xi1>
    %131 = vector.broadcast %130 : vector<8x1xi1> to vector<8x128xi1>
    %132 = arith.select %131, %127, %96 : vector<8x128xi1>, vector<8x128xf32>
    %133 = vector.shape_cast %15 : vector<8x1xi1> to vector<8x1xi1>
    %134 = vector.broadcast %133 : vector<8x1xi1> to vector<8x128xi1>
    %135 = arith.select %134, %129, %99 : vector<8x128xi1>, vector<8x128xf32>
    %136 = vector.extract_strided_slice %9 {offsets = [3, 0, 0], sizes = [1, 8, 512], strides = [1, 1, 1]} : vector<8x8x512xf32> to vector<1x8x512xf32>
    %137 = vector.shape_cast %136 : vector<1x8x512xf32> to vector<8x512xf32>
    %138 = arith.truncf %135 : vector<8x128xf32> to vector<8x128xbf16>
    %cst_24 = arith.constant dense<0.000000e+00> : vector<8x512xf32>
    %139 = tpu.matmul %138, %1, %cst_24 {dimension_numbers = #tpu.dot_dimension_numbers<[1], [0], [0], [1], [0, 0, 1, 1], [], []>} : vector<8x128xbf16>, vector<128x512xbf16>, vector<8x512xf32> -> vector<8x512xf32>
    %140 = arith.addf %137, %139 : vector<8x512xf32>
    %141 = vector.extract_strided_slice %140 {offsets = [0, 0], sizes = [8, 128], strides = [1, 1]} : vector<8x512xf32> to vector<8x128xf32>
    %142 = arith.negf %141 : vector<8x128xf32>
    %143 = math.exp %142 : vector<8x128xf32>
    %cst_25 = arith.constant 1.000000e+00 : f32
    %144 = vector.broadcast %cst_25 : f32 to vector<8x128xf32>
    %145 = arith.addf %144, %143 : vector<8x128xf32>
    %146 = arith.divf %144, %145 : vector<8x128xf32>
    %147 = vector.extract_strided_slice %140 {offsets = [0, 128], sizes = [8, 128], strides = [1, 1]} : vector<8x512xf32> to vector<8x128xf32>
    %148 = arith.negf %147 : vector<8x128xf32>
    %149 = math.exp %148 : vector<8x128xf32>
    %cst_26 = arith.constant 1.000000e+00 : f32
    %150 = vector.broadcast %cst_26 : f32 to vector<8x128xf32>
    %151 = arith.addf %150, %149 : vector<8x128xf32>
    %152 = arith.divf %150, %151 : vector<8x128xf32>
    %153 = vector.extract_strided_slice %140 {offsets = [0, 256], sizes = [8, 128], strides = [1, 1]} : vector<8x512xf32> to vector<8x128xf32>
    %154 = math.tanh %153 : vector<8x128xf32>
    %155 = vector.extract_strided_slice %140 {offsets = [0, 384], sizes = [8, 128], strides = [1, 1]} : vector<8x512xf32> to vector<8x128xf32>
    %156 = arith.negf %155 : vector<8x128xf32>
    %157 = math.exp %156 : vector<8x128xf32>
    %cst_27 = arith.constant 1.000000e+00 : f32
    %158 = vector.broadcast %cst_27 : f32 to vector<8x128xf32>
    %159 = arith.addf %158, %157 : vector<8x128xf32>
    %160 = arith.divf %158, %159 : vector<8x128xf32>
    %161 = arith.mulf %152, %132 : vector<8x128xf32>
    %162 = arith.mulf %146, %154 : vector<8x128xf32>
    %163 = arith.addf %161, %162 : vector<8x128xf32>
    %164 = math.tanh %163 : vector<8x128xf32>
    %165 = arith.mulf %160, %164 : vector<8x128xf32>
    %166 = vector.shape_cast %17 : vector<8x1xi1> to vector<8x1xi1>
    %167 = vector.broadcast %166 : vector<8x1xi1> to vector<8x128xi1>
    %168 = arith.select %167, %163, %132 : vector<8x128xi1>, vector<8x128xf32>
    %169 = vector.shape_cast %17 : vector<8x1xi1> to vector<8x1xi1>
    %170 = vector.broadcast %169 : vector<8x1xi1> to vector<8x128xi1>
    %171 = arith.select %170, %165, %135 : vector<8x128xi1>, vector<8x128xf32>
    %172 = vector.extract_strided_slice %9 {offsets = [4, 0, 0], sizes = [1, 8, 512], strides = [1, 1, 1]} : vector<8x8x512xf32> to vector<1x8x512xf32>
    %173 = vector.shape_cast %172 : vector<1x8x512xf32> to vector<8x512xf32>
    %174 = arith.truncf %171 : vector<8x128xf32> to vector<8x128xbf16>
    %cst_28 = arith.constant dense<0.000000e+00> : vector<8x512xf32>
    %175 = tpu.matmul %174, %1, %cst_28 {dimension_numbers = #tpu.dot_dimension_numbers<[1], [0], [0], [1], [0, 0, 1, 1], [], []>} : vector<8x128xbf16>, vector<128x512xbf16>, vector<8x512xf32> -> vector<8x512xf32>
    %176 = arith.addf %173, %175 : vector<8x512xf32>
    %177 = vector.extract_strided_slice %176 {offsets = [0, 0], sizes = [8, 128], strides = [1, 1]} : vector<8x512xf32> to vector<8x128xf32>
    %178 = arith.negf %177 : vector<8x128xf32>
    %179 = math.exp %178 : vector<8x128xf32>
    %cst_29 = arith.constant 1.000000e+00 : f32
    %180 = vector.broadcast %cst_29 : f32 to vector<8x128xf32>
    %181 = arith.addf %180, %179 : vector<8x128xf32>
    %182 = arith.divf %180, %181 : vector<8x128xf32>
    %183 = vector.extract_strided_slice %176 {offsets = [0, 128], sizes = [8, 128], strides = [1, 1]} : vector<8x512xf32> to vector<8x128xf32>
    %184 = arith.negf %183 : vector<8x128xf32>
    %185 = math.exp %184 : vector<8x128xf32>
    %cst_30 = arith.constant 1.000000e+00 : f32
    %186 = vector.broadcast %cst_30 : f32 to vector<8x128xf32>
    %187 = arith.addf %186, %185 : vector<8x128xf32>
    %188 = arith.divf %186, %187 : vector<8x128xf32>
    %189 = vector.extract_strided_slice %176 {offsets = [0, 256], sizes = [8, 128], strides = [1, 1]} : vector<8x512xf32> to vector<8x128xf32>
    %190 = math.tanh %189 : vector<8x128xf32>
    %191 = vector.extract_strided_slice %176 {offsets = [0, 384], sizes = [8, 128], strides = [1, 1]} : vector<8x512xf32> to vector<8x128xf32>
    %192 = arith.negf %191 : vector<8x128xf32>
    %193 = math.exp %192 : vector<8x128xf32>
    %cst_31 = arith.constant 1.000000e+00 : f32
    %194 = vector.broadcast %cst_31 : f32 to vector<8x128xf32>
    %195 = arith.addf %194, %193 : vector<8x128xf32>
    %196 = arith.divf %194, %195 : vector<8x128xf32>
    %197 = arith.mulf %188, %168 : vector<8x128xf32>
    %198 = arith.mulf %182, %190 : vector<8x128xf32>
    %199 = arith.addf %197, %198 : vector<8x128xf32>
    %200 = math.tanh %199 : vector<8x128xf32>
    %201 = arith.mulf %196, %200 : vector<8x128xf32>
    %202 = vector.shape_cast %19 : vector<8x1xi1> to vector<8x1xi1>
    %203 = vector.broadcast %202 : vector<8x1xi1> to vector<8x128xi1>
    %204 = arith.select %203, %199, %168 : vector<8x128xi1>, vector<8x128xf32>
    %205 = vector.shape_cast %19 : vector<8x1xi1> to vector<8x1xi1>
    %206 = vector.broadcast %205 : vector<8x1xi1> to vector<8x128xi1>
    %207 = arith.select %206, %201, %171 : vector<8x128xi1>, vector<8x128xf32>
    %208 = vector.extract_strided_slice %9 {offsets = [5, 0, 0], sizes = [1, 8, 512], strides = [1, 1, 1]} : vector<8x8x512xf32> to vector<1x8x512xf32>
    %209 = vector.shape_cast %208 : vector<1x8x512xf32> to vector<8x512xf32>
    %210 = arith.truncf %207 : vector<8x128xf32> to vector<8x128xbf16>
    %cst_32 = arith.constant dense<0.000000e+00> : vector<8x512xf32>
    %211 = tpu.matmul %210, %1, %cst_32 {dimension_numbers = #tpu.dot_dimension_numbers<[1], [0], [0], [1], [0, 0, 1, 1], [], []>} : vector<8x128xbf16>, vector<128x512xbf16>, vector<8x512xf32> -> vector<8x512xf32>
    %212 = arith.addf %209, %211 : vector<8x512xf32>
    %213 = vector.extract_strided_slice %212 {offsets = [0, 0], sizes = [8, 128], strides = [1, 1]} : vector<8x512xf32> to vector<8x128xf32>
    %214 = arith.negf %213 : vector<8x128xf32>
    %215 = math.exp %214 : vector<8x128xf32>
    %cst_33 = arith.constant 1.000000e+00 : f32
    %216 = vector.broadcast %cst_33 : f32 to vector<8x128xf32>
    %217 = arith.addf %216, %215 : vector<8x128xf32>
    %218 = arith.divf %216, %217 : vector<8x128xf32>
    %219 = vector.extract_strided_slice %212 {offsets = [0, 128], sizes = [8, 128], strides = [1, 1]} : vector<8x512xf32> to vector<8x128xf32>
    %220 = arith.negf %219 : vector<8x128xf32>
    %221 = math.exp %220 : vector<8x128xf32>
    %cst_34 = arith.constant 1.000000e+00 : f32
    %222 = vector.broadcast %cst_34 : f32 to vector<8x128xf32>
    %223 = arith.addf %222, %221 : vector<8x128xf32>
    %224 = arith.divf %222, %223 : vector<8x128xf32>
    %225 = vector.extract_strided_slice %212 {offsets = [0, 256], sizes = [8, 128], strides = [1, 1]} : vector<8x512xf32> to vector<8x128xf32>
    %226 = math.tanh %225 : vector<8x128xf32>
    %227 = vector.extract_strided_slice %212 {offsets = [0, 384], sizes = [8, 128], strides = [1, 1]} : vector<8x512xf32> to vector<8x128xf32>
    %228 = arith.negf %227 : vector<8x128xf32>
    %229 = math.exp %228 : vector<8x128xf32>
    %cst_35 = arith.constant 1.000000e+00 : f32
    %230 = vector.broadcast %cst_35 : f32 to vector<8x128xf32>
    %231 = arith.addf %230, %229 : vector<8x128xf32>
    %232 = arith.divf %230, %231 : vector<8x128xf32>
    %233 = arith.mulf %224, %204 : vector<8x128xf32>
    %234 = arith.mulf %218, %226 : vector<8x128xf32>
    %235 = arith.addf %233, %234 : vector<8x128xf32>
    %236 = math.tanh %235 : vector<8x128xf32>
    %237 = arith.mulf %232, %236 : vector<8x128xf32>
    %238 = vector.shape_cast %21 : vector<8x1xi1> to vector<8x1xi1>
    %239 = vector.broadcast %238 : vector<8x1xi1> to vector<8x128xi1>
    %240 = arith.select %239, %235, %204 : vector<8x128xi1>, vector<8x128xf32>
    %241 = vector.shape_cast %21 : vector<8x1xi1> to vector<8x1xi1>
    %242 = vector.broadcast %241 : vector<8x1xi1> to vector<8x128xi1>
    %243 = arith.select %242, %237, %207 : vector<8x128xi1>, vector<8x128xf32>
    %244 = vector.extract_strided_slice %9 {offsets = [6, 0, 0], sizes = [1, 8, 512], strides = [1, 1, 1]} : vector<8x8x512xf32> to vector<1x8x512xf32>
    %245 = vector.shape_cast %244 : vector<1x8x512xf32> to vector<8x512xf32>
    %246 = arith.truncf %243 : vector<8x128xf32> to vector<8x128xbf16>
    %cst_36 = arith.constant dense<0.000000e+00> : vector<8x512xf32>
    %247 = tpu.matmul %246, %1, %cst_36 {dimension_numbers = #tpu.dot_dimension_numbers<[1], [0], [0], [1], [0, 0, 1, 1], [], []>} : vector<8x128xbf16>, vector<128x512xbf16>, vector<8x512xf32> -> vector<8x512xf32>
    %248 = arith.addf %245, %247 : vector<8x512xf32>
    %249 = vector.extract_strided_slice %248 {offsets = [0, 0], sizes = [8, 128], strides = [1, 1]} : vector<8x512xf32> to vector<8x128xf32>
    %250 = arith.negf %249 : vector<8x128xf32>
    %251 = math.exp %250 : vector<8x128xf32>
    %cst_37 = arith.constant 1.000000e+00 : f32
    %252 = vector.broadcast %cst_37 : f32 to vector<8x128xf32>
    %253 = arith.addf %252, %251 : vector<8x128xf32>
    %254 = arith.divf %252, %253 : vector<8x128xf32>
    %255 = vector.extract_strided_slice %248 {offsets = [0, 128], sizes = [8, 128], strides = [1, 1]} : vector<8x512xf32> to vector<8x128xf32>
    %256 = arith.negf %255 : vector<8x128xf32>
    %257 = math.exp %256 : vector<8x128xf32>
    %cst_38 = arith.constant 1.000000e+00 : f32
    %258 = vector.broadcast %cst_38 : f32 to vector<8x128xf32>
    %259 = arith.addf %258, %257 : vector<8x128xf32>
    %260 = arith.divf %258, %259 : vector<8x128xf32>
    %261 = vector.extract_strided_slice %248 {offsets = [0, 256], sizes = [8, 128], strides = [1, 1]} : vector<8x512xf32> to vector<8x128xf32>
    %262 = math.tanh %261 : vector<8x128xf32>
    %263 = vector.extract_strided_slice %248 {offsets = [0, 384], sizes = [8, 128], strides = [1, 1]} : vector<8x512xf32> to vector<8x128xf32>
    %264 = arith.negf %263 : vector<8x128xf32>
    %265 = math.exp %264 : vector<8x128xf32>
    %cst_39 = arith.constant 1.000000e+00 : f32
    %266 = vector.broadcast %cst_39 : f32 to vector<8x128xf32>
    %267 = arith.addf %266, %265 : vector<8x128xf32>
    %268 = arith.divf %266, %267 : vector<8x128xf32>
    %269 = arith.mulf %260, %240 : vector<8x128xf32>
    %270 = arith.mulf %254, %262 : vector<8x128xf32>
    %271 = arith.addf %269, %270 : vector<8x128xf32>
    %272 = math.tanh %271 : vector<8x128xf32>
    %273 = arith.mulf %268, %272 : vector<8x128xf32>
    %274 = vector.shape_cast %23 : vector<8x1xi1> to vector<8x1xi1>
    %275 = vector.broadcast %274 : vector<8x1xi1> to vector<8x128xi1>
    %276 = arith.select %275, %271, %240 : vector<8x128xi1>, vector<8x128xf32>
    %277 = vector.shape_cast %23 : vector<8x1xi1> to vector<8x1xi1>
    %278 = vector.broadcast %277 : vector<8x1xi1> to vector<8x128xi1>
    %279 = arith.select %278, %273, %243 : vector<8x128xi1>, vector<8x128xf32>
    %280 = vector.extract_strided_slice %9 {offsets = [7, 0, 0], sizes = [1, 8, 512], strides = [1, 1, 1]} : vector<8x8x512xf32> to vector<1x8x512xf32>
    %281 = vector.shape_cast %280 : vector<1x8x512xf32> to vector<8x512xf32>
    %282 = arith.truncf %279 : vector<8x128xf32> to vector<8x128xbf16>
    %cst_40 = arith.constant dense<0.000000e+00> : vector<8x512xf32>
    %283 = tpu.matmul %282, %1, %cst_40 {dimension_numbers = #tpu.dot_dimension_numbers<[1], [0], [0], [1], [0, 0, 1, 1], [], []>} : vector<8x128xbf16>, vector<128x512xbf16>, vector<8x512xf32> -> vector<8x512xf32>
    %284 = arith.addf %281, %283 : vector<8x512xf32>
    %285 = vector.extract_strided_slice %284 {offsets = [0, 0], sizes = [8, 128], strides = [1, 1]} : vector<8x512xf32> to vector<8x128xf32>
    %286 = arith.negf %285 : vector<8x128xf32>
    %287 = math.exp %286 : vector<8x128xf32>
    %cst_41 = arith.constant 1.000000e+00 : f32
    %288 = vector.broadcast %cst_41 : f32 to vector<8x128xf32>
    %289 = arith.addf %288, %287 : vector<8x128xf32>
    %290 = arith.divf %288, %289 : vector<8x128xf32>
    %291 = vector.extract_strided_slice %284 {offsets = [0, 128], sizes = [8, 128], strides = [1, 1]} : vector<8x512xf32> to vector<8x128xf32>
    %292 = arith.negf %291 : vector<8x128xf32>
    %293 = math.exp %292 : vector<8x128xf32>
    %cst_42 = arith.constant 1.000000e+00 : f32
    %294 = vector.broadcast %cst_42 : f32 to vector<8x128xf32>
    %295 = arith.addf %294, %293 : vector<8x128xf32>
    %296 = arith.divf %294, %295 : vector<8x128xf32>
    %297 = vector.extract_strided_slice %284 {offsets = [0, 256], sizes = [8, 128], strides = [1, 1]} : vector<8x512xf32> to vector<8x128xf32>
    %298 = math.tanh %297 : vector<8x128xf32>
    %299 = vector.extract_strided_slice %284 {offsets = [0, 384], sizes = [8, 128], strides = [1, 1]} : vector<8x512xf32> to vector<8x128xf32>
    %300 = arith.negf %299 : vector<8x128xf32>
    %301 = math.exp %300 : vector<8x128xf32>
    %cst_43 = arith.constant 1.000000e+00 : f32
    %302 = vector.broadcast %cst_43 : f32 to vector<8x128xf32>
    %303 = arith.addf %302, %301 : vector<8x128xf32>
    %304 = arith.divf %302, %303 : vector<8x128xf32>
    %305 = arith.mulf %296, %276 : vector<8x128xf32>
    %306 = arith.mulf %290, %298 : vector<8x128xf32>
    %307 = arith.addf %305, %306 : vector<8x128xf32>
    %308 = math.tanh %307 : vector<8x128xf32>
    %309 = arith.mulf %304, %308 : vector<8x128xf32>
    %310 = vector.shape_cast %25 : vector<8x1xi1> to vector<8x1xi1>
    %311 = vector.broadcast %310 : vector<8x1xi1> to vector<8x128xi1>
    %312 = arith.select %311, %309, %279 : vector<8x128xi1>, vector<8x128xf32>
    %313 = arith.truncf %312 : vector<8x128xf32> to vector<8x128xbf16>
    %c0_44 = arith.constant 0 : index
    %c0_45 = arith.constant 0 : index
    %314 = vector.load %arg6[%c0_44, %c0_45] : memref<128x128xbf16, #tpu.memory_space<vmem>>, vector<128x128xbf16>
    %cst_46 = arith.constant dense<0.000000e+00> : vector<8x128xf32>
    %315 = tpu.matmul %313, %314, %cst_46 {dimension_numbers = #tpu.dot_dimension_numbers<[1], [0], [0], [1], [0, 0, 1, 1], [], []>} : vector<8x128xbf16>, vector<128x128xbf16>, vector<8x128xf32> -> vector<8x128xf32>
    %c0_47 = arith.constant 0 : index
    %c0_48 = arith.constant 0 : index
    %316 = vector.load %arg7[%c0_47, %c0_48] : memref<1x128xf32, #tpu.memory_space<vmem>>, vector<1x128xf32>
    %317 = vector.broadcast %316 : vector<1x128xf32> to vector<8x128xf32>
    %318 = arith.addf %315, %317 : vector<8x128xf32>
    %cst_49 = arith.constant 0.000000e+00 : f32
    %319 = vector.broadcast %cst_49 : f32 to vector<8x128xf32>
    %320 = arith.maximumf %318, %319 : vector<8x128xf32>
    %c0_50 = arith.constant 0 : index
    %c0_51 = arith.constant 0 : index
    %321 = vector.load %arg8[%c0_50, %c0_51] : memref<1x128xf32, #tpu.memory_space<vmem>>, vector<1x128xf32>
    %322 = vector.broadcast %321 : vector<1x128xf32> to vector<8x128xf32>
    %323 = arith.mulf %320, %322 : vector<8x128xf32>
    %cst_52 = arith.constant dense<0.000000e+00> : vector<8xf32>
    %324 = vector.multi_reduction <add>, %323, %cst_52 [1] : vector<8x128xf32> to vector<8xf32>
    %325 = vector.shape_cast %324 : vector<8xf32> to vector<8x1xf32>
    %c0_53 = arith.constant 0 : index
    %c0_54 = arith.constant 0 : index
    %326 = vector.load %arg9[%c0_53, %c0_54] : memref<1x1xf32, #tpu.memory_space<vmem>>, vector<1x1xf32>
    %327 = vector.broadcast %326 : vector<1x1xf32> to vector<8x1xf32>
    %328 = arith.addf %325, %327 : vector<8x1xf32>
    %329 = arith.negf %328 : vector<8x1xf32>
    %330 = math.exp %329 : vector<8x1xf32>
    %cst_55 = arith.constant 1.000000e+00 : f32
    %331 = vector.broadcast %cst_55 : f32 to vector<8x1xf32>
    %332 = arith.addf %331, %330 : vector<8x1xf32>
    %333 = arith.divf %331, %332 : vector<8x1xf32>
    %334 = vector.shape_cast %333 : vector<8x1xf32> to vector<8x1xf32>
    %335 = vector.broadcast %334 : vector<8x1xf32> to vector<8x128xf32>
    %c0_56 = arith.constant 0 : index
    %c0_57 = arith.constant 0 : index
    %336 = vector.load %arg10[%c0_56, %c0_57] : memref<8x128xf32, #tpu.memory_space<vmem>>, vector<8x128xf32>
    tpu.vector_store %arg10[%c0_56, %c0_57], %335 {strides = array<i32>} : memref<8x128xf32, #tpu.memory_space<vmem>>, vector<8x128xf32>,
    return
  }
  func.func @transform_0(%arg0: i32) -> (i32, i32, i32) {
    %c0_i32 = arith.constant 0 : i32
    %c0_i32_0 = arith.constant 0 : i32
    %c0_i32_1 = arith.constant 0 : i32
    return %c0_i32, %arg0, %c0_i32_0 : i32, i32, i32
  }
  func.func @transform_1(%arg0: i32) -> (i32, i32) {
    %c0_i32 = arith.constant 0 : i32
    %c0_i32_0 = arith.constant 0 : i32
    return %arg0, %c0_i32 : i32, i32
  }
  func.func @transform_2(%arg0: i32) -> (i32, i32) {
    %c0_i32 = arith.constant 0 : i32
    %c0_i32_0 = arith.constant 0 : i32
    %c0_i32_1 = arith.constant 0 : i32
    return %c0_i32, %c0_i32_0 : i32, i32
  }
  func.func @transform_3(%arg0: i32) -> (i32, i32) {
    %c0_i32 = arith.constant 0 : i32
    %c0_i32_0 = arith.constant 0 : i32
    %c0_i32_1 = arith.constant 0 : i32
    return %c0_i32, %c0_i32_0 : i32, i32
  }
  func.func @transform_4(%arg0: i32) -> (i32, i32) {
    %c0_i32 = arith.constant 0 : i32
    %c0_i32_0 = arith.constant 0 : i32
    %c0_i32_1 = arith.constant 0 : i32
    return %c0_i32, %c0_i32_0 : i32, i32
  }
  func.func @transform_5(%arg0: i32) -> (i32, i32) {
    %c0_i32 = arith.constant 0 : i32
    %c0_i32_0 = arith.constant 0 : i32
    %c0_i32_1 = arith.constant 0 : i32
    return %c0_i32, %c0_i32_0 : i32, i32
  }
  func.func @transform_6(%arg0: i32) -> (i32, i32) {
    %c0_i32 = arith.constant 0 : i32
    %c0_i32_0 = arith.constant 0 : i32
    %c0_i32_1 = arith.constant 0 : i32
    return %c0_i32, %c0_i32_0 : i32, i32
  }
  func.func @transform_7(%arg0: i32) -> (i32, i32) {
    %c0_i32 = arith.constant 0 : i32
    %c0_i32_0 = arith.constant 0 : i32
    %c0_i32_1 = arith.constant 0 : i32
    return %c0_i32, %c0_i32_0 : i32, i32
  }
  func.func @transform_8(%arg0: i32) -> (i32, i32) {
    %c0_i32 = arith.constant 0 : i32
    %c0_i32_0 = arith.constant 0 : i32
    %c0_i32_1 = arith.constant 0 : i32
    return %c0_i32, %c0_i32_0 : i32, i32
  }
  func.func @transform_9(%arg0: i32) -> (i32, i32) {
    %c0_i32 = arith.constant 0 : i32
    %c0_i32_0 = arith.constant 0 : i32
    return %arg0, %c0_i32 : i32, i32
  }
}

</mosaic_0001>

<bundles_post_ra>
// kernel: tpu_custom_call.1
= control target key start
LH: loop header
LB: loop body
LE: loop exit
PB: predicated region body
PF: predicated region fallthrough
CT: control target
= control target key end

     0   :  { %s3716_s0 = inlined_call_operand.hbm [shape: f32[8,16,20], index: 0, kind: input, shape index: {}]   ;;  %s3717_s1 = inlined_call_operand.vmem [shape: s32[16,1], index: 1, kind: input, shape index: {}]   ;;  %s3718_s2 = inlined_call_operand.hbm [shape: bf16[20,512], index: 2, kind: input, shape index: {}]   ;;  %s3719_s3 = inlined_call_operand.hbm [shape: bf16[128,512], index: 3, kind: input, shape index: {}]   ;;  %s3720_s4 = inlined_call_operand.vmem [shape: f32[1,512], index: 4, kind: input, shape index: {}]   ;;  %s3721_s5 = inlined_call_operand.hbm [shape: bf16[128,128], index: 5, kind: input, shape index: {}]   ;;  %s3722_s6 = inlined_call_operand.vmem [shape: f32[1,128], index: 6, kind: input, shape index: {}]   ;;  %s3723_s7 = inlined_call_operand.vmem [shape: f32[1,128], index: 7, kind: input, shape index: {}]   ;;  %s3724_s8 = inlined_call_operand.<no memory space> [shape: f32[1,1], index: 8, kind: input, shape index: {}]   ;;  %s3725_s9 = inlined_call_operand.hbm [shape: f32[16,128], index: 9, kind: output, shape index: {}]  }
   0x1   :  { %3738 = sst [smem:[#allocation42_spill]] %s3718_s2  ;;  %v14_v0 = vstv %s3724_s8 }
   0x2   :  { %3739 = sst [smem:[#allocation43_spill]] %s3725_s9  ;;  %15 = vst [vmem:[#allocation2] sm:$0x1] %v14_v0 }
   0x3   :  { %16 = vsyncpa [#allocation4], 0 }
   0x4   :  { %18 = vsyncpa [#allocation4 + $0x1], 0 }
   0x5   :  { %19 = vsyncpa [#allocation7], 0 }
   0x6   :  { %20 = vsyncpa [#allocation10], 0 }
   0x7   :  { %21 = vsyncpa [#allocation5], 0 }
   0x8   :  { %23 = vsyncpa [#allocation5 + $0x1], 0  ;;  %s2814_s11 = smov 0   ;;  %s2816_s12 = smov 0  }
   0x9   :  { %s2818_s13 = smov 0   ;;  %s2820_s14 = smov 0  }
   0xa LB: > { %3740 = sst [smem:[#allocation16_spill]] %s2733_s11  ;;  %s2835_s8 = sadd.s32 4294967295, %s2745_s14   ;;  %s2745_s14 = sphi %s2820_s14, %s3813_s14   ;;  %s2741_s13 = sphi %s2818_s13, %s3817_s13   ;;  %s2737_s12 = sphi %s2816_s12, %s3816_s12   ;;  %s2733_s11 = sphi %s2814_s11, %s3815_s11  }
   0xb   : > { %s2091_s15 = sadd.s32 4294967294, %s2745_s14   ;;  %s2839_s16 = sadd.s32 1, %s2745_s14  }
   0xc   : > { %3741 = sst [smem:[#allocation17_spill]] %s2839_s16  ;;  %s36_s17 = sadd.s32 1, %s2741_s13 }
   0xd   : > { %s33_s18 = ssub.s32 %s2745_s14, %s2839_s16  ;;  %p43_p0 = scmp.ne.s32.totalorder %s2741_s13, %s2737_s12 }
   0xe   : > { %p34_p1 = scmp.eq.s32.totalorder %s33_s18, 0  ;;  %p44_p2 = scmp.eq.s32.totalorder %s2745_s14, 0 }
   0xf   : > { %p49_p3 = scmp.ne.s32.totalorder %s2737_s12, %s2733_s11  ;;  %p3728_p4 = scmp.eq.s32.totalorder %s2835_s8, 0 }
  0x10   : > { %s2851_s19 = scalar_select %p34_p1, %s2741_s13, %s36_s17  }
  0x11   : > { %p2853_p5 = por %p44_p2, %p43_p0  ;;  %p2859_p6 = por %p3728_p4, %p49_p3 }
  0x12   : > { %3742 = sst [smem:[#allocation18_spill]] %s2851_s19  ;;  %p246_p7 = scmp.eq.s32.totalorder %s2835_s8, 1 }
  0x13   : > { %s3743_s20 = scalar_select %p2853_p5, 1, 0 }
  0x14   : > { %s3744_s21 = scalar_select %p2859_p6, 1, 0 }
  0x15   : > { %p252_p8 = scmp.eq.s32.totalorder %s2091_s15, 1  ;;  %p2092_p9 = scmp.ge.s32.totalorder %s2745_s14, 1 }
  0x16   : > { %p259_p10 = scmp.lt.s32.totalorder %s2745_s14, 3  ;;  %p2866_p11 = por %p246_p7, %p43_p0 }
  0x17   : > { %p2870_p12 = por %p252_p8, %p49_p3  ;;  %s2747_s25 = smov [#allocation6]  }
  0x18   : > { %s3745_s22 = scalar_select %p2866_p11, 1, 0 }
  0x19   : > { %s3746_s23 = scalar_select %p2870_p12, 1, 0 }
  0x1a   : > { %p2874_p13 = pnand %p2092_p9, %p259_p10  ;;  %s271_s26 = sshll.u32 %s2747_s25, 4  ;;  %s272_s26 = int_to_ptr.vmem [resolvable:$true] %s271_s26 }
  0x1b   : > { %3747 = sst [smem:[#allocation19_spill]] %s3746_s23  ;;  %s2748_s28 = smov [#allocation8]  }
  0x1c   : > { %s3748_s24 = scalar_select %p2874_p13, 1, 0 }
  0x1d   : > { %p2255_p1 = pneg %p2874_p13  ;;  %s284_s29 = sshll.u32 %s2748_s28, 4  ;;  %s285_s29 = int_to_ptr.vmem [resolvable:$true] %s284_s29 }
  0x1e   : > { %s3750_s2 = sld [smem:[#allocation42_spill]] }
  0x1f   : > { %p2882_p2 = pnand %p2255_p1, %p3728_p4 }
  0x21   : > { %p2896_p8 = pneg %p2882_p2 }
  0x24   : > { %s2557_s15 = scalar_lea.hbm %s3750_s2, 768 }
  0x25   : > { %p2558_p7 = scmp.ne.s32.totalorder %s3750_s2, %s2557_s15  ;;  %p2564_p1 = scmp.lt.u32.totalorder %s2557_s15, %s3750_s2 }
  0x27   : > { %p2560_p9 = pnand %p2896_p8, %p2558_p7 }
  0x29   : > { %p2561_p10 = pneg %p2560_p9 }
  0x2b   : > { %p2566_p0 = pnand %p2564_p1, %p2561_p10 }
  0x2d   : > { %2569 = shalt.err (!%p2566_p0)
}
  0x2e   : > { %s2570_s28 = scalar_lea.vmem %s272_s26, 768  ;;  %p2578_p11 = scmp.lt.s32.totalorder %s272_s26, %s272_s26 }
  0x2f   : > { %p2571_p4 = scmp.ne.s32.totalorder %s272_s26, %s2570_s28  ;;  %p2579_p6 = scmp.lt.s32.totalorder %s2570_s28, %s2570_s28 }
  0x31   : > { %p2573_p3 = pnand %p2571_p4, %p2896_p8  ;;  %p2580_p13 = por %p2579_p6, %p2578_p11 }
  0x33   : > { %p2574_p12 = pneg %p2573_p3 }
  0x35   : > { %p2581_p5 = pnand %p2580_p13, %p2574_p12 }
  0x37   : > { %2584 = shalt.err (!%p2581_p5)
}
  0x38   : > { %s2749_s30 = smov 256   ;;  %s2750_s16 = smov 16  }
  0x39   : > { %2258 = dma.hbm_to_vmem [thread:$0]  (!%p2882_p2), %s3750_s2, 768, %s272_s26, [#allocation7], %s2749_s30, %s2749_s30, %s2750_s16  }
  0x3a   : > { %p3752_p4 = scmp.ne.s32.totalorder %s3743_s20, 0  ;;  %p3753_p0 = scmp.lt.s32.totalorder %s2745_s14, 2 }
  0x3b   : > { %s2585_s28 = scalar_lea.hbm %s3719_s3, 4096 }
  0x3c   : > { %p2918_p3 = pnand %p3753_p0, %p3752_p4  ;;  %p2586_p5 = scmp.ne.s32.totalorder %s3719_s3, %s2585_s28 }
  0x3d   : > { %p2592_p12 = scmp.lt.u32.totalorder %s2585_s28, %s3719_s3 }
  0x3e   : > { %s3754_s15 = scalar_select %p2918_p3, 1, 0 }
  0x3f   : > { %p2588_p6 = pnand %p2586_p5, %p2896_p8 }
  0x41   : > { %p2589_p11 = pneg %p2588_p6 }
  0x43   : > { %p2594_p13 = pnand %p2592_p12, %p2589_p11 }
  0x45   : > { %2597 = shalt.err (!%p2594_p13)
}
  0x46   : > { %s2598_s20 = scalar_lea.vmem %s285_s29, 4096  ;;  %p2606_p1 = scmp.lt.s32.totalorder %s285_s29, %s285_s29 }
  0x47   : > { %p2599_p7 = scmp.ne.s32.totalorder %s285_s29, %s2598_s20  ;;  %p2607_p4 = scmp.lt.s32.totalorder %s2598_s20, %s2598_s20 }
  0x49   : > { %p2601_p9 = pnand %p2599_p7, %p2896_p8  ;;  %p2608_p0 = por %p2607_p4, %p2606_p1 }
  0x4b   : > { %p2602_p10 = pneg %p2601_p9 }
  0x4d   : > { %p2609_p3 = pnand %p2608_p0, %p2602_p10 }
  0x4f   : > { %2612 = shalt.err (!%p2609_p3)
}
  0x50   : > { %2261 = dma.hbm_to_vmem [thread:$0]  (!%p2882_p2), %s3719_s3, 4096, %s285_s29, [#allocation7], %s2749_s30, %s2749_s30, %s2750_s16  }
  0x51   : > { %s2751_s10 = smov [#allocation9]   ;;  %s2613_s19 = scalar_lea.hbm %s3721_s5, 1024 }
  0x52   : > { %s300_s17 = sshll.u32 %s2751_s10, 4  ;;  %p2614_p3 = scmp.ne.s32.totalorder %s3721_s5, %s2613_s19  ;;  %s301_s17 = int_to_ptr.vmem [resolvable:$true] %s300_s17 }
  0x53   : > { %p2620_p11 = scmp.lt.u32.totalorder %s2613_s19, %s3721_s5 }
  0x54   : > { %p2616_p5 = pnand %p2614_p3, %p2896_p8 }
  0x56   : > { %p2617_p6 = pneg %p2616_p5 }
  0x58   : > { %p2622_p12 = pnand %p2620_p11, %p2617_p6 }
  0x5a   : > { %2625 = shalt.err (!%p2622_p12)
}
  0x5b   : > { %s2626_s29 = scalar_lea.vmem %s301_s17, 1024  ;;  %p2634_p10 = scmp.lt.s32.totalorder %s301_s17, %s301_s17 }
  0x5c   : > { %p2627_p13 = scmp.ne.s32.totalorder %s301_s17, %s2626_s29  ;;  %p2635_p1 = scmp.lt.s32.totalorder %s2626_s29, %s2626_s29 }
  0x5e   : > { %p2629_p7 = pnand %p2627_p13, %p2896_p8  ;;  %p2636_p4 = por %p2635_p1, %p2634_p10 }
  0x60   : > { %p2630_p9 = pneg %p2629_p7 }
  0x62   : > { %p2637_p0 = pnand %p2636_p4, %p2630_p9 }
  0x64   : > { %2640 = shalt.err (!%p2637_p0)
}
  0x65   : > { %s2752_s16 = smov 64   ;;  %s2753_s2 = smov 4  }
  0x66   : > { %2264 = dma.hbm_to_vmem [thread:$0]  (!%p2882_p2), %s3721_s5, 1024, %s301_s17, [#allocation10], %s2752_s16, %s2752_s16, %s2753_s2  }
  0x67   : > { %s323_s25 = sand.u32 1, %s2741_s13   ;;  %s2098_s23 = sshll.u32 %s2745_s14, 7 }
  0x68   : > { %s2097_s10 = sshll.u32 %s323_s25, 6  ;;  %s2965_s19 = scalar_lea.hbm %s3716_s0, %s2098_s23 }
  0x69   : > { %s327_s26 = scalar_lea.vmem [#allocation3], %s2097_s10  ;;  %s2969_s27 = scalar_lea.sflag [#allocation4], %s323_s25 }
  0x6a   : > { %s333_s20 = sshll.u32 %s327_s26, 4  ;;  %s2641_s29 = scalar_lea.hbm %s2965_s19, 1024  ;;  %s2967_s20 = int_to_ptr.vmem [resolvable:$true] %s333_s20 }
  0x6b   : > { %p2642_p2 = scmp.ne.s32.totalorder %s2965_s19, %s2641_s29  ;;  %p3755_p8 = scmp.ne.s32.totalorder %s3754_s15, 0 }
  0x6c   : > { %s2646_s2 = scalar_lea.hbm %s3716_s0, 2048  ;;  %p2647_p11 = scmp.lt.u32.totalorder %s2965_s19, %s3716_s0 }
  0x6d   : > { %p2643_p3 = pneg %p3755_p8  ;;  %p2648_p12 = scmp.lt.u32.totalorder %s2646_s2, %s2641_s29 }
  0x6e   : > { %p2650_p7 = scmp.lt.u32.totalorder %s2641_s29, %s2965_s19 }
  0x6f   : > { %p2644_p5 = pnand %p2643_p3, %p2642_p2  ;;  %p2649_p13 = por %p2648_p12, %p2647_p11 }
  0x71   : > { %p2645_p6 = pneg %p2644_p5  ;;  %p2651_p9 = por %p2650_p7, %p2649_p13 }
  0x73   : > { %p2652_p10 = pnand %p2651_p9, %p2645_p6 }
  0x75   : > { %2655 = shalt.err (!%p2652_p10)
}
  0x76   : > { %s2656_s25 = scalar_lea.vmem %s2967_s20, 1024  ;;  %s2754_s23 = smov [#allocation3]  }
  0x77   : > { %p2657_p1 = scmp.ne.s32.totalorder %s2967_s20, %s2656_s25  ;;  %s2661_s10 = sshll.u32 %s2754_s23, 4  ;;  %s2662_s10 = int_to_ptr.vmem [resolvable:$false] %s2661_s10 }
  0x78   : > { %s2663_s18 = scalar_lea.vmem %s2662_s10, 2048  ;;  %p2664_p2 = scmp.lt.s32.totalorder %s2967_s20, %s2662_s10 }
  0x79   : > { %p2659_p4 = pnand %p2657_p1, %p2643_p3  ;;  %p2665_p5 = scmp.lt.s32.totalorder %s2663_s18, %s2656_s25 }
  0x7b   : > { %p2660_p0 = pneg %p2659_p4  ;;  %p2666_p11 = por %p2665_p5, %p2664_p2 }
  0x7d   : > { %p2667_p12 = pnand %p2666_p11, %p2660_p0 }
  0x7f   : > { %2670 = shalt.err (!%p2667_p12)
}
  0x80   : > { %s2755_s28 = smov 128   ;;  %s2756_s26 = smov 8  }
  0x81   : > { %2268 = dma.hbm_to_vmem [thread:$0]  (!%p3755_p8), %s2965_s19, 1024, %s2967_s20, %s2969_s27, %s2749_s30, %s2755_s28, %s2756_s26  }
  0x82   : > { %p3756_p3 = scmp.ne.s32.totalorder %s3748_s24, 0 }
  0x84   : > { %352 = sbr.rel (%p3756_p3) target bundleno = 2809 (0xaf9), region = 56 }
  0x8b   : > { %s3001_s29 = sand.u32 1, %s2737_s12   ;;  %p3757_p6 = scmp.ne.s32.totalorder %s3744_s21, 0 }
  0x8c   : > { %s2100_s17 = sshll.u32 %s3001_s29, 6  ;;  %s355_s16 = scalar_lea.sflag [#allocation4], %s3001_s29 }
  0x8d   : > { %s3005_s2 = scalar_lea.vmem [#allocation3], %s2100_s17 }
  0x8e   : > { %2716 = dma.done.wait (%p3757_p6), %s355_s16, 1024  }
  0x8f   : > { %2718 = vsyncadd (%p3757_p6), %s355_s16, 4294966272  ;;  %p3758_p8 = scmp.eq.s32.totalorder %s2835_s8, 0 }
  0x91   : > { %2720 = dma.done.wait (%p3758_p8), [#allocation7], 4864   ;;  %p3759_p13 = pmov %p3758_p8 }
  0x92   : > { %p3760_p7 = pmov %p3758_p8 }
  0x93   : > { %2722 = vsyncadd (%p3759_p13), [#allocation7], 4294962432 }
  0x94   : > { %2724 = dma.done.wait (%p3760_p7), [#allocation10], 1024   ;;  %p3761_p9 = pmov %p3760_p7 }
  0x95   : > { %v3736_v1 = vmov 0   ;;  %v2327_v2 = vld [vmem:[#allocation6 + $0x4] ss:$16 sps:$4 sm:$0xff]   ;;  %v2329_v3 = vld [vmem:[#allocation6 + $0xc] ss:$16 sps:$4 sm:$0xff]   ;;  %vm554_vm0 = vcmask 1041408   ;;  %v471_v63 = vlaneseq }
  0x96   : > { %2726 = vsyncadd (%p3761_p9), [#allocation10], 4294966272  ;;  %599 = vmatprep.mubr.bf16.mxu0 %v3736_v1  ;;  %672 = vmatprep.mubr.bf16.mxu1 %v3736_v1  ;;  %v2331_v4 = vld [vmem:[#allocation6] ss:$16 sps:$4 sm:$0xff]   ;;  %v2332_v5 = vld [vmem:[#allocation6 + $0x8] ss:$16 sps:$4 sm:$0xff]  }
  0x97   : > { %2325 = vset.pattern.permute.xlu0 %v3736_v1  ;;  %2326 = vset.pattern.permute.xlu1 %v3736_v1  ;;  %v467_v6 = vld [vmem:[#allocation6 + $0x20] sm:$0x33]  ;;  %v468_v8 = vld [vmem:[#allocation6 + $0x28] sm:$0x33]  ;;  %vm541_vm1 = vcmask 162816   ;;  %v449_v25 = vld [vmem:[%s3005_s2 + $0x10] sm:$0xff] }
  0x98   : > { %567 = vmatprep.subr.bf16.mxu0 %v2327_v2  ;;  %640 = vmatprep.subr.bf16.mxu1 %v2329_v3  ;;  %v2115_v7 = vcombine.high %v467_v6, %v467_v6  ;;  %v2114_v9 = vcombine.low %v467_v6, %v467_v6  ;;  %v447_v10 = vld [vmem:[%s3005_s2] sm:$0xff]  ;;  %v448_v11 = vld [vmem:[%s3005_s2 + $0x8] sm:$0xff]  ;;  %v2117_v12 = vcombine.high %v468_v8, %v468_v8  ;;  %v450_v26 = vld [vmem:[%s3005_s2 + $0x18] sm:$0xff]  ;;  %p409_p10 = scmp.lt.s32.totalorder %s2835_s8, 1  ;;  %v472_v0 = vshrl.u32 %v471_v63, 7  ;;  %s2104_s10 = sshll.u32 %s3001_s29, 3 }
  0x99   : > { %568 = vmatpush1.bf16.msra.mxu0 %v2331_v4  ;;  %641 = vmatpush1.bf16.msra.mxu1 %v2332_v5  ;;  %v2116_v13 = vcombine.low %v468_v8, %v468_v8  ;;  %v3025_v14 = vld [vmem:[#allocation8 + $0x4] ss:$16 sps:$4 sm:$0xff]   ;;  %v3029_v16 = vld [vmem:[#allocation8 + $0xc] ss:$16 sps:$4 sm:$0xff]   ;;  %v2206_v18 = vpack.c.bf16 %v448_v11, %v447_v10  ;;  %v3033_v19 = vld [vmem:[#allocation8] ss:$16 sps:$4 sm:$0xff]   ;;  %v2207_v29 = vpack.c.bf16 %v450_v26, %v449_v25 }
  0x9a   : > { %2118 = vmatprep.subr.msk.bf16.mxu0 %vm554_vm0, %v2115_v7  ;;  %v556_v15 = vsel %vm554_vm0, %v2114_v9, 0  ;;  %2123 = vmatprep.subr.msk.bf16.mxu1 %vm554_vm0, %v2117_v12  ;;  %v3035_v20 = vld [vmem:[#allocation8 + $0x8] ss:$16 sps:$4 sm:$0xff]   ;;  %v3039_v21 = vld [vmem:[#allocation8 + $0x24] ss:$16 sps:$4 sm:$0xff]   ;;  %s410_s21 = scalar_select %p409_p10, %s2835_s8, 1 }
  0x9b   : > { %v562_v17 = vsel %vm554_vm0, %v2116_v13, 0  ;;  %v3041_v22 = vld [vmem:[#allocation8 + $0x2c] ss:$16 sps:$4 sm:$0xff]   ;;  %v3043_v23 = vld [vmem:[#allocation8 + $0x20] ss:$16 sps:$4 sm:$0xff]   ;;  %v481_v2 = vsub.s32 2, %v472_v0 }
  0x9c   : > { %v3045_v24 = vld [vmem:[#allocation8 + $0x28] ss:$16 sps:$4 sm:$0xff]   ;;  %v3053_v27 = vld [vmem:[#allocation8 + $0x44] ss:$16 sps:$4 sm:$0xff]   ;;  %v3057_v28 = vld [vmem:[#allocation8 + $0x4c] ss:$16 sps:$4 sm:$0xff]  }
  0x9d   : > { %570 = vmatpush1.bf16.msra.mxu0 %v556_v15  ;;  %643 = vmatpush1.bf16.msra.mxu1 %v562_v17  ;;  %v3062_v30 = vld [vmem:[#allocation8 + $0x40] ss:$16 sps:$4 sm:$0xff]   ;;  %v3064_v31 = vld [vmem:[#allocation8 + $0x48] ss:$16 sps:$4 sm:$0xff]   ;;  %v3068_v32 = vld [vmem:[#allocation8 + $0x64] ss:$16 sps:$4 sm:$0xff]  }
  0x9e   : > { %881 = vmatprep.subr.bf16.mxu0 %v3025_v14  ;;  %922 = vmatprep.subr.bf16.mxu1 %v3029_v16  ;;  %v3072_v33 = vld [vmem:[#allocation8 + $0x6c] ss:$16 sps:$4 sm:$0xff]   ;;  %v3075_v34 = vld [vmem:[#allocation8 + $0x60] ss:$16 sps:$4 sm:$0xff]   ;;  %v3079_v35 = vld [vmem:[#allocation8 + $0x68] ss:$16 sps:$4 sm:$0xff]  }
  0x9f   : > { %v451_v36 = vld [vmem:[%s3005_s2 + $0x20] sm:$0xff]  ;;  %v452_v37 = vld [vmem:[%s3005_s2 + $0x28] sm:$0xff]  ;;  %s2105_s24 = sshll.u32 %s410_s21, 3  ;;  %v453_v47 = vld [vmem:[%s3005_s2 + $0x30] sm:$0xff]  ;;  %v485_v3 = vsub.s32 3, %v472_v0  ;;  %v473_v4 = vsub.s32 0, %v472_v0 }
  0xa0   : > { %2119 = vmatmul.mubr.msk.bf16.vlgmr.msra.gmra.mrb[0].mxu0 %vm541_vm1, %v2206_v18  ;;  %2124 = vmatmul.mubr.msk.bf16.vlgmr.msra.gmra.mrb[0].mxu1 %vm541_vm1, %v2206_v18  ;;  %v3087_v38 = vld [vmem:[#allocation8 + $0x84] ss:$16 sps:$4 sm:$0xff]   ;;  %v3089_v39 = vld [vmem:[#allocation8 + $0x8c] ss:$16 sps:$4 sm:$0xff]   ;;  %v2208_v40 = vpack.c.bf16 %v452_v37, %v451_v36  ;;  %v3093_v41 = vld [vmem:[#allocation8 + $0x80] ss:$16 sps:$4 sm:$0xff]   ;;  %s412_s19 = scalar_lea.vmem %s3717_s1, %s2105_s24 }
  0xa1   : > { %882 = vmatpush1.bf16.msra.mxu0 %v3033_v19  ;;  %923 = vmatpush1.bf16.msra.mxu1 %v3035_v20  ;;  %v3097_v42 = vld [vmem:[#allocation8 + $0x88] ss:$16 sps:$4 sm:$0xff]   ;;  %v3099_v43 = vld [vmem:[#allocation8 + $0xa4] ss:$16 sps:$4 sm:$0xff]   ;;  %v3106_v44 = vld [vmem:[#allocation8 + $0xac] ss:$16 sps:$4 sm:$0xff]  }
  0xa2   : > { %883 = vmatprep.subr.bf16.mxu0 %v3039_v21  ;;  %924 = vmatprep.subr.bf16.mxu1 %v3041_v22  ;;  %v3108_v45 = vld [vmem:[#allocation8 + $0xa0] ss:$16 sps:$4 sm:$0xff]   ;;  %v3112_v46 = vld [vmem:[#allocation8 + $0xa8] ss:$16 sps:$4 sm:$0xff]   ;;  %v3120_v50 = vld [vmem:[#allocation8 + $0xc4] ss:$16 sps:$4 sm:$0xff]  }
  0xa3   : > { %609 = vmatprep.mubr.bf16.mxu0 %v3736_v1  ;;  %682 = vmatprep.mubr.bf16.mxu1 %v3736_v1  ;;  %v3115_v48 = vld [vmem:[%s412_s19] sm:$0xff]  ;;  %v3133_v54 = vld [vmem:[#allocation8 + $0xc8] ss:$16 sps:$4 sm:$0xff]   ;;  %v477_v6 = vsub.s32 1, %v472_v0  ;;  %s408_s18 = scalar_lea.vmem [#allocation11], %s2104_s10  ;;  %s2203_s26 = sshll.u32 %s2835_s8, 7 }
  0xa4   : > { %v454_v49 = vld [vmem:[%s3005_s2 + $0x38] sm:$0xff]  ;;  %vm713_vm2 = vcmp.gt.s32.totalorder %v3115_v48, 0  ;;  %vm714_vm3 = vcmp.gt.s32.totalorder %v3115_v48, 1  ;;  %v3131_v53 = vld [vmem:[#allocation8 + $0xc0] ss:$16 sps:$4 sm:$0xff]   ;;  %vm717_vm4 = vcmp.gt.s32.totalorder %v3115_v48, 4 }
  0xa5   : > { %884 = vmatpush1.bf16.msra.mxu0 %v3043_v23  ;;  %925 = vmatpush1.bf16.msra.mxu1 %v3045_v24  ;;  %v3125_v51 = vld [vmem:[#allocation8 + $0xcc] ss:$16 sps:$4 sm:$0xff]   ;;  %v991_v52 = vsel %vm713_vm2, 1, %v3736_v1  ;;  %v2209_v55 = vpack.c.bf16 %v454_v49, %v453_v47  ;;  %v3135_v56 = vld [vmem:[#allocation8 + $0xe4] ss:$16 sps:$4 sm:$0xff]   ;;  %v1109_v60 = vsel %vm714_vm3, 1, %v3736_v1 }
  0xa6   : > { %885 = vmatprep.subr.bf16.mxu0 %v3053_v27  ;;  %926 = vmatprep.subr.bf16.mxu1 %v3057_v28  ;;  %v3137_v57 = vld [vmem:[#allocation8 + $0xec] ss:$16 sps:$4 sm:$0xff]   ;;  %v3147_v58 = vld [vmem:[#allocation8 + $0xe0] ss:$16 sps:$4 sm:$0xff]   ;;  %v3149_v59 = vld [vmem:[#allocation8 + $0xe8] ss:$16 sps:$4 sm:$0xff]  }
  0xa7   : > { %993 = vperm.xlu0 %2325, %v991_v52   ;;  %v1463_v61 = vsel %vm717_vm4, 1, %v3736_v1  ;;  %vm719_vm5 = vcmp.gt.s32.totalorder %v3115_v48, 6  ;;  %v469_v5 = vld [vmem:[%s3720_s4] sm:$0xf]  ;;  %vm715_vm8 = vcmp.gt.s32.totalorder %v3115_v48, 2  ;;  %vm716_vm9 = vcmp.gt.s32.totalorder %v3115_v48, 3 }
  0xa8   : > { %2120 = vmatmul.mubr.msk.bf16.gmra.mrb[4].mxu0 %vm541_vm1, %v2207_v29  ;;  %2125 = vmatmul.mubr.msk.bf16.gmra.mrb[4].mxu1 %vm541_vm1, %v2207_v29  ;;  %v1699_v62 = vsel %vm719_vm5, 1, %v3736_v1  ;;  %v3205_v7 = vrot.slane %v469_v5, %v481_v2  ;;  %v3211_v10 = vrot.slane %v469_v5, %v485_v3  ;;  %v474_v11 = vrot.slane %v469_v5, %v473_v4  ;;  %s1980_s28 = sshll.u32 %s408_s18, 4  ;;  %s3807_s2 = sld [smem:[#allocation43_spill]]  ;;  %s3669_s28 = int_to_ptr.vmem [resolvable:$true] %s1980_s28 }
  0xa9   : > { %886 = vmatpush1.bf16.msra.mxu0 %v3062_v30  ;;  %927 = vmatpush1.bf16.msra.mxu1 %v3064_v31  ;;  %v478_v15 = vrot.slane %v469_v5, %v477_v6  ;;  %vm718_vm10 = vcmp.gt.s32.totalorder %v3115_v48, 5  ;;  %vm720_vm11 = vcmp.gt.s32.totalorder %v3115_v48, 7  ;;  %vm2759_vm2 = vmmov 0   ;;  %s1967_s24 = scalar_lea.sflag [#allocation5], %s3001_s29  ;;  %s2671_s30 = scalar_lea.vmem %s3669_s28, 128 }
  0xaa   : > { %887 = vmatprep.subr.bf16.mxu0 %v3068_v32  ;;  %928 = vmatprep.subr.bf16.mxu1 %v3072_v33  ;;  %p2672_p1 = scmp.ne.s32.totalorder %s3669_s28, %s2671_s30  ;;  %p3808_p4 = scmp.ne.s32.totalorder %s3745_s22, 0 }
  0xab   : > { %619 = vmatprep.mubr.bf16.mxu0 %v3736_v1  ;;  %692 = vmatprep.mubr.bf16.mxu1 %v3736_v1  ;;  %s2760_s15 = smov [#allocation11]  }
  0xac   : > { %1111 = vperm.xlu0 %2325, %v1109_v60   ;;  %p2673_p0 = pnand %p2672_p1, %p3808_p4  ;;  %s2675_s8 = sshll.u32 %s2760_s15, 4  ;;  %s2676_s8 = int_to_ptr.vmem [resolvable:$false] %s2675_s8 }
  0xad   : > { %888 = vmatpush1.bf16.msra.mxu0 %v3075_v34  ;;  %929 = vmatpush1.bf16.msra.mxu1 %v3079_v35  ;;  %s2677_s19 = scalar_lea.vmem %s2676_s8, 256  ;;  %p2678_p5 = scmp.lt.s32.totalorder %s3669_s28, %s2676_s8 }
  0xae   : > { %889 = vmatprep.subr.bf16.mxu0 %v3087_v38  ;;  %930 = vmatprep.subr.bf16.mxu1 %v3089_v39  ;;  %s3674_s21 = scalar_lea.hbm %s3807_s2, %s2203_s26  ;;  %p2674_p2 = pneg %p2673_p0 }
  0xaf   : > { %p2679_p11 = scmp.lt.s32.totalorder %s2677_s19, %s2671_s30 }
  0xb0   : > { %2121 = vmatmul.mubr.msk.bf16.gmra.mrb[8].mxu0 %vm541_vm1, %v2208_v40  ;;  %2126 = vmatmul.mubr.msk.bf16.gmra.mrb[8].mxu1 %vm541_vm1, %v2208_v40 }
  0xb1   : > { %890 = vmatpush1.bf16.msra.mxu0 %v3093_v41  ;;  %931 = vmatpush1.bf16.msra.mxu1 %v3097_v42  ;;  %p2680_p12 = por %p2679_p11, %p2678_p5 }
  0xb2   : > { %891 = vmatprep.subr.bf16.mxu0 %v3099_v43  ;;  %932 = vmatprep.subr.bf16.mxu1 %v3106_v44 }
  0xb3   : > { %629 = vmatprep.mubr.bf16.mxu0 %v3736_v1  ;;  %702 = vmatprep.mubr.bf16.mxu1 %v3736_v1  ;;  %p2681_p3 = pnand %p2680_p12, %p2674_p2 }
  0xb4   : > { %1465 = vperm.xlu0 %2325, %v1463_v61  }
  0xb5   : > { %892 = vmatpush1.bf16.msra.mxu0 %v3108_v45  ;;  %933 = vmatpush1.bf16.msra.mxu1 %v3112_v46 }
  0xb6   : > { %893 = vmatprep.subr.bf16.mxu0 %v3120_v50  ;;  %934 = vmatprep.subr.bf16.mxu1 %v3125_v51 }
  0xb8   : > { %2122 = vmatmul.mubr.msk.bf16.gmra.mrb[12].mxu0 %vm541_vm1, %v2209_v55  ;;  %2127 = vmatmul.mubr.msk.bf16.gmra.mrb[12].mxu1 %vm541_vm1, %v2209_v55 }
  0xb9   : > { %894 = vmatpush1.bf16.msra.mxu0 %v3131_v53  ;;  %935 = vmatpush1.bf16.msra.mxu1 %v3133_v54 }
  0xba   : > { %895 = vmatprep.subr.bf16.mxu0 %v3135_v56  ;;  %936 = vmatprep.subr.bf16.mxu1 %v3137_v57 }
  0xbb   : > { %913 = vmatprep.mubr.bf16.mxu0 %v3736_v1  ;;  %954 = vmatprep.mubr.bf16.mxu1 %v3736_v1 }
  0xbc   : > { %1701 = vperm.xlu0 %2325, %v1699_v62  }
  0xbd   : > { %896 = vmatpush1.bf16.msra.mxu0 %v3147_v58  ;;  %937 = vmatpush1.bf16.msra.mxu1 %v3149_v59 }
  0xbe   : > { %999 = vmatprep.subr.bf16.mxu0 %v3025_v14  ;;  %1040 = vmatprep.subr.bf16.mxu1 %v3029_v16 }
  0xc0   : > { %914 = vmatmul.mubr.bf16.vlgmr.msra.gmra.mrb[16].mxu0 %v3736_v1  ;;  %955 = vmatmul.mubr.bf16.vlgmr.msra.gmra.mrb[16].mxu1 %v3736_v1 }
  0xc1   : > { %1000 = vmatpush1.bf16.msra.mxu0 %v3033_v19  ;;  %1041 = vmatpush1.bf16.msra.mxu1 %v3035_v20 }
  0xc2   : > { %1001 = vmatprep.subr.bf16.mxu0 %v3039_v21  ;;  %1042 = vmatprep.subr.bf16.mxu1 %v3041_v22 }
  0xc3   : > { %1031 = vmatprep.mubr.bf16.mxu0 %v3736_v1  ;;  %1072 = vmatprep.mubr.bf16.mxu1 %v3736_v1 }
  0xc5   : > { %1002 = vmatpush1.bf16.msra.mxu0 %v3043_v23  ;;  %1043 = vmatpush1.bf16.msra.mxu1 %v3045_v24 }
  0xc6   : > { %1003 = vmatprep.subr.bf16.mxu0 %v3053_v27  ;;  %1044 = vmatprep.subr.bf16.mxu1 %v3057_v28 }
  0xc9   : > { %1004 = vmatpush1.bf16.msra.mxu0 %v3062_v30  ;;  %1045 = vmatpush1.bf16.msra.mxu1 %v3064_v31 }
  0xca   : > { %1005 = vmatprep.subr.bf16.mxu0 %v3068_v32  ;;  %1046 = vmatprep.subr.bf16.mxu1 %v3072_v33 }
  0xcd   : > { %1006 = vmatpush1.bf16.msra.mxu0 %v3075_v34  ;;  %1047 = vmatpush1.bf16.msra.mxu1 %v3079_v35 }
  0xce   : > { %1007 = vmatprep.subr.bf16.mxu0 %v3087_v38  ;;  %1048 = vmatprep.subr.bf16.mxu1 %v3089_v39 }
  0xd1   : > { %1008 = vmatpush1.bf16.msra.mxu0 %v3093_v41  ;;  %1049 = vmatpush1.bf16.msra.mxu1 %v3097_v42 }
  0xd2   : > { %1009 = vmatprep.subr.bf16.mxu0 %v3099_v43  ;;  %1050 = vmatprep.subr.bf16.mxu1 %v3106_v44 }
  0xd5   : > { %1010 = vmatpush1.bf16.msra.mxu0 %v3108_v45  ;;  %1051 = vmatpush1.bf16.msra.mxu1 %v3112_v46 }
  0xd6   : > { %1011 = vmatprep.subr.bf16.mxu0 %v3120_v50  ;;  %1052 = vmatprep.subr.bf16.mxu1 %v3125_v51 }
  0xd9   : > { %1012 = vmatpush1.bf16.msra.mxu0 %v3131_v53  ;;  %1053 = vmatpush1.bf16.msra.mxu1 %v3133_v54 }
  0xda   : > { %1013 = vmatprep.subr.bf16.mxu0 %v3135_v56  ;;  %1054 = vmatprep.subr.bf16.mxu1 %v3137_v57 }
  0xdd   : > { %1014 = vmatpush1.bf16.msra.mxu0 %v3147_v58  ;;  %1055 = vmatpush1.bf16.msra.mxu1 %v3149_v59 }
  0xde   : > { %1117 = vmatprep.subr.bf16.mxu0 %v3025_v14  ;;  %1158 = vmatprep.subr.bf16.mxu1 %v3029_v16 }
 0x173   : > { %v3207_v8 = vpop.f32.mrb[0].mxu0  ;;  %v3209_v9 = vpop.f32.mrb[0].mxu1 }
 0x174   : > { %v603_v12 = vpop.f32.mrb[1].mxu0  ;;  %v676_v13 = vpop.f32.mrb[1].mxu1 }
 0x175   : > { %v605_v17 = vpop.f32.mrb[2].mxu0  ;;  %v678_v18 = vpop.f32.mrb[2].mxu1 }
 0x176   : > { %v3213_v25 = vadd.f32 %v605_v17, %v474_v11  ;;  %v607_v26 = vpop.f32.mrb[3].mxu0  ;;  %v3216_v29 = vadd.f32 %v678_v18, %v3205_v7  ;;  %v680_v36 = vpop.f32.mrb[3].mxu1 }
 0x177   : > { %v3218_v37 = vadd.f32 %v607_v26, %v478_v15  ;;  %v3221_v40 = vadd.f32 %v680_v36, %v3211_v10 }
 0x17b   : > { %v611_v47 = vpop.f32.mrb[4].mxu0  ;;  %v684_v49 = vpop.f32.mrb[4].mxu1 }
 0x17c   : > { %v3223_v52 = vadd.f32 %v611_v47, %v474_v11  ;;  %v613_v55 = vpop.f32.mrb[5].mxu0  ;;  %v3226_v60 = vadd.f32 %v684_v49, %v3205_v7  ;;  %v686_v61 = vpop.f32.mrb[5].mxu1 }
 0x17d   : > { %v3228_v62 = vadd.f32 %v613_v55, %v478_v15  ;;  %v615_v63 = vpop.f32.mrb[6].mxu0  ;;  %v3231_v0 = vadd.f32 %v686_v61, %v3211_v10  ;;  %v688_v2 = vpop.f32.mrb[6].mxu1 }
 0x17e   : > { %v3233_v3 = vadd.f32 %v615_v63, %v474_v11  ;;  %v617_v4 = vpop.f32.mrb[7].mxu0  ;;  %v3236_v5 = vadd.f32 %v688_v2, %v3205_v7  ;;  %v690_v6 = vpop.f32.mrb[7].mxu1 }
 0x17f   : > { %3762 = vst [vmem:[#allocation20_spill] sm:$0xff] %v3228_v62  ;;  %3763 = vst [vmem:[#allocation21_spill] sm:$0xff] %v3231_v0  ;;  %v3238_v17 = vadd.f32 %v617_v4, %v478_v15  ;;  %v3241_v18 = vadd.f32 %v690_v6, %v3211_v10 }
 0x180   : > { %3764 = vst [vmem:[#allocation22_spill] sm:$0xff] %v3233_v3  ;;  %3765 = vst [vmem:[#allocation23_spill] sm:$0xff] %v3236_v5 }
 0x181   : > { %3766 = vst [vmem:[#allocation24_spill] sm:$0xff] %v3238_v17  ;;  %3767 = vst [vmem:[#allocation25_spill] sm:$0xff] %v3241_v18 }
 0x183   : > { %v621_v26 = vpop.f32.mrb[8].mxu0  ;;  %v694_v36 = vpop.f32.mrb[8].mxu1 }
 0x184   : > { %v3243_v47 = vadd.f32 %v621_v26, %v474_v11  ;;  %v623_v49 = vpop.f32.mrb[9].mxu0  ;;  %v3246_v55 = vadd.f32 %v694_v36, %v3205_v7  ;;  %v696_v61 = vpop.f32.mrb[9].mxu1 }
 0x185   : > { %v3248_v63 = vadd.f32 %v623_v49, %v478_v15  ;;  %v625_v1 = vpop.f32.mrb[10].mxu0  ;;  %v3251_v2 = vadd.f32 %v696_v61, %v3211_v10  ;;  %v698_v4 = vpop.f32.mrb[10].mxu1 }
 0x186   : > { %3768 = vst [vmem:[#allocation26_spill] sm:$0xff] %v3243_v47  ;;  %3769 = vst [vmem:[#allocation27_spill] sm:$0xff] %v3246_v55  ;;  %v3253_v17 = vadd.f32 %v625_v1, %v474_v11  ;;  %v627_v6 = vpop.f32.mrb[11].mxu0  ;;  %v3256_v18 = vadd.f32 %v698_v4, %v3205_v7  ;;  %v700_v26 = vpop.f32.mrb[11].mxu1 }
 0x187   : > { %3770 = vst [vmem:[#allocation28_spill] sm:$0xff] %v3248_v63  ;;  %3771 = vst [vmem:[#allocation29_spill] sm:$0xff] %v3251_v2  ;;  %v3258_v47 = vadd.f32 %v627_v6, %v478_v15  ;;  %v3261_v36 = vadd.f32 %v700_v26, %v3211_v10 }
 0x188   : > { %3772 = vst [vmem:[#allocation30_spill] sm:$0xff] %v3253_v17  ;;  %3773 = vst [vmem:[#allocation31_spill] sm:$0xff] %v3256_v18 }
 0x189   : > { %3774 = vst [vmem:[#allocation32_spill] sm:$0xff] %v3258_v47  ;;  %3775 = vst [vmem:[#allocation33_spill] sm:$0xff] %v3261_v36 }
 0x18b   : > { %v631_v55 = vpop.f32.mrb[12].mxu0  ;;  %v704_v49 = vpop.f32.mrb[12].mxu1 }
 0x18c   : > { %v3263_v63 = vadd.f32 %v631_v55, %v474_v11  ;;  %v633_v5 = vpop.f32.mrb[13].mxu0  ;;  %v3266_v61 = vadd.f32 %v704_v49, %v3205_v7  ;;  %v706_v1 = vpop.f32.mrb[13].mxu1 }
 0x18d   : > { %v3268_v17 = vadd.f32 %v633_v5, %v478_v15  ;;  %v635_v2 = vpop.f32.mrb[14].mxu0  ;;  %v3271_v4 = vadd.f32 %v706_v1, %v3211_v10  ;;  %v708_v6 = vpop.f32.mrb[14].mxu1  ;;  %v602_v5 = vadd.f32 %v3207_v8, %v474_v11  ;;  %v604_v1 = vadd.f32 %v603_v12, %v478_v15 }
 0x18e   : > { %3776 = vst [vmem:[#allocation34_spill] sm:$0xff] %v3263_v63  ;;  %3777 = vst [vmem:[#allocation35_spill] sm:$0xff] %v3266_v61  ;;  %v3273_v47 = vadd.f32 %v635_v2, %v474_v11  ;;  %v637_v26 = vpop.f32.mrb[15].mxu0  ;;  %v3276_v36 = vadd.f32 %v708_v6, %v3205_v7  ;;  %v710_v55 = vpop.f32.mrb[15].mxu1 }
 0x18f   : > { %3778 = vst [vmem:[#allocation36_spill] sm:$0xff] %v3268_v17  ;;  %3779 = vst [vmem:[#allocation37_spill] sm:$0xff] %v3271_v4  ;;  %v3278_v63 = vadd.f32 %v637_v26, %v478_v15  ;;  %v3281_v49 = vadd.f32 %v710_v55, %v3211_v10  ;;  %v675_v17 = vadd.f32 %v3209_v9, %v3205_v7 }
 0x190   : > { %3780 = vst [vmem:[#allocation38_spill] sm:$0xff] %v3273_v47  ;;  %3781 = vst [vmem:[#allocation39_spill] sm:$0xff] %v3276_v36  ;;  %v677_v4 = vadd.f32 %v676_v13, %v3211_v10 }
 0x191   : > { %3782 = vst [vmem:[#allocation40_spill] sm:$0xff] %v3278_v63  ;;  %3783 = vst [vmem:[#allocation41_spill] sm:$0xff] %v3281_v49 }
 0x193   : > { %v915_v2 = vpop.f32.mrb[16].mxu0  ;;  %v956_v47 = vpop.f32.mrb[16].mxu1 }
 0x194   : > { %v963_v61 = vadd.f32 %v915_v2, %v602_v5  ;;  %v965_v18 = vadd.f32 %v956_v47, %v675_v17  ;;  %v917_v6 = vpop.f32.mrb[17].mxu0  ;;  %v958_v36 = vpop.f32.mrb[17].mxu1  ;;  %v3784_v5 = vmov 0  }
 0x195   : > { %v964_v3 = vadd.f32 %v917_v6, %v604_v1  ;;  %v966_v26 = vadd.f32 %v958_v36, %v677_v4  ;;  %v919_v63 = vpop.f32.mrb[18].mxu0  ;;  %v960_v0 = vpop.f32.mrb[18].mxu1  ;;  %v1227_v1 = vsel %vm715_vm8, 1, %v3784_v5  ;;  %v1345_v2 = vsel %vm716_vm9, 1, %v3784_v5 }
 0x196   : > { %v2160_v55 = vmul.f32 -1.442695, %v963_v61  ;;  %v920_v49 = vpop.f32.mrb[19].mxu0  ;;  %v961_v62 = vpop.f32.mrb[19].mxu1  ;;  %1229 = vperm.xlu1 %2326, %v1227_v1   ;;  %v1581_v6 = vsel %vm718_vm10, 1, %v3784_v5 }
 0x197   : > { %v2161_v8 = vmul.f32 -1.442695, %v964_v3  ;;  %v2162_v7 = vmul.f32 -1.442695, %v966_v26  ;;  %v3290_v3 = vpop.permute.xlu0 %993  ;;  %v1817_v26 = vsel %vm720_vm11, 1, %v3784_v5 }
 0x198   : > { %2393 = vpow2.f32 %v2160_v55  ;;  %vm995_vm6 = vcmp.eq.s32.totalorder %v3290_v3, 1 }
 0x199   : > { %2395 = vpow2.f32 %v2161_v8  ;;  %vm2163_vm7 = vmpackc.low %vm995_vm6, %vm995_vm6 }
 0x19a   : > { %2397 = vpow2.f32 %v2162_v7  ;;  %1347 = vperm.xlu1 %2326, %v1345_v2  }
 0x19b   : > { %2399 = vtanh.f32 %v965_v18 }
 0x19e   : > { %1583 = vperm.xlu1 %2326, %v1581_v6  }
 0x1a2   : > { %v2394_v9 = vpop.eup %2393  ;;  %1819 = vperm.xlu1 %2326, %v1817_v26  }
 0x1a3   : > { %v2396_v11 = vpop.eup %2395  ;;  %v970_v10 = vadd.f32 1.0, %v2394_v9 }
 0x1a4   : > { %v976_v12 = vadd.f32 1.0, %v2396_v11  ;;  %v2398_v13 = vpop.eup %2397 }
 0x1a5   : > { %2401 = vrcp.f32 %v970_v10  ;;  %v2400_v15 = vpop.eup %2399  ;;  %v983_v0 = vadd.f32 1.0, %v2398_v13 }
 0x1a6   : > { %2403 = vrcp.f32 %v976_v12 }
 0x1a7   : > { %2405 = vrcp.f32 %v983_v0 }
 0x1af   : > { %v2402_v17 = vpop.eup %2401 }
 0x1b0   : > { %v2404_v47 = vpop.eup %2403  ;;  %v987_v63 = vmul.f32 %v2402_v17, %v2400_v15 }
 0x1b1   : > { %v986_v36 = vmul.f32 0.0, %v2404_v47  ;;  %v2406_v61 = vpop.eup %2405 }
 0x1b3   : > { %v3287_v62 = vadd.f32 %v987_v63, %v986_v36 }
 0x1b5   : > { %2407 = vtanh.f32 %v3287_v62  ;;  %v996_v2 = vsel %vm995_vm6, %v3287_v62, 0.0 }
 0x1bf   : > { %v2408_v4 = vpop.eup %2407 }
 0x1c0   : > { %v3292_v18 = vmul.f32 %v2408_v4, %v2406_v61 }
 0x1c2   : > { %v2164_v49 = vpack.c.bf16 %v3292_v18, %v3292_v18 }
 0x1c4   : > { %2165 = vmatmul.mubr.msk.bf16.vlgmr.msra.gmra.mrb[20].mxu0 %vm2163_vm7, %v2164_v49  ;;  %2168 = vmatmul.mubr.msk.bf16.vlgmr.msra.gmra.mrb[20].mxu1 %vm2163_vm7, %v2164_v49 }
 0x1c5   : > { %1118 = vmatpush1.bf16.msra.mxu0 %v3033_v19  ;;  %1159 = vmatpush1.bf16.msra.mxu1 %v3035_v20 }
 0x1c6   : > { %1119 = vmatprep.subr.bf16.mxu0 %v3039_v21  ;;  %1160 = vmatprep.subr.bf16.mxu1 %v3041_v22 }
 0x1c7   : > { %1149 = vmatprep.mubr.bf16.mxu0 %v3784_v5  ;;  %1190 = vmatprep.mubr.bf16.mxu1 %v3784_v5 }
 0x1c9   : > { %1120 = vmatpush1.bf16.msra.mxu0 %v3043_v23  ;;  %1161 = vmatpush1.bf16.msra.mxu1 %v3045_v24 }
 0x1ca   : > { %1121 = vmatprep.subr.bf16.mxu0 %v3053_v27  ;;  %1162 = vmatprep.subr.bf16.mxu1 %v3057_v28 }
 0x1cd   : > { %1122 = vmatpush1.bf16.msra.mxu0 %v3062_v30  ;;  %1163 = vmatpush1.bf16.msra.mxu1 %v3064_v31 }
 0x1ce   : > { %1123 = vmatprep.subr.bf16.mxu0 %v3068_v32  ;;  %1164 = vmatprep.subr.bf16.mxu1 %v3072_v33 }
 0x1d1   : > { %1124 = vmatpush1.bf16.msra.mxu0 %v3075_v34  ;;  %1165 = vmatpush1.bf16.msra.mxu1 %v3079_v35 }
 0x1d2   : > { %1125 = vmatprep.subr.bf16.mxu0 %v3087_v38  ;;  %1166 = vmatprep.subr.bf16.mxu1 %v3089_v39 }
 0x1d5   : > { %1126 = vmatpush1.bf16.msra.mxu0 %v3093_v41  ;;  %1167 = vmatpush1.bf16.msra.mxu1 %v3097_v42 }
 0x1d6   : > { %1127 = vmatprep.subr.bf16.mxu0 %v3099_v43  ;;  %1168 = vmatprep.subr.bf16.mxu1 %v3106_v44 }
 0x1d9   : > { %1128 = vmatpush1.bf16.msra.mxu0 %v3108_v45  ;;  %1169 = vmatpush1.bf16.msra.mxu1 %v3112_v46 }
 0x1da   : > { %1129 = vmatprep.subr.bf16.mxu0 %v3120_v50  ;;  %1170 = vmatprep.subr.bf16.mxu1 %v3125_v51 }
 0x1dd   : > { %1130 = vmatpush1.bf16.msra.mxu0 %v3131_v53  ;;  %1171 = vmatpush1.bf16.msra.mxu1 %v3133_v54 }
 0x1de   : > { %1131 = vmatprep.subr.bf16.mxu0 %v3135_v56  ;;  %1172 = vmatprep.subr.bf16.mxu1 %v3137_v57 }
 0x1e1   : > { %1132 = vmatpush1.bf16.msra.mxu0 %v3147_v58  ;;  %1173 = vmatpush1.bf16.msra.mxu1 %v3149_v59 }
 0x1e2   : > { %1235 = vmatprep.subr.bf16.mxu0 %v3025_v14  ;;  %1276 = vmatprep.subr.bf16.mxu1 %v3029_v16 }
 0x297   : > { %v1033_v55 = vpop.f32.mrb[20].mxu0  ;;  %v1074_v8 = vpop.f32.mrb[20].mxu1 }
 0x298   : > { %v1081_v7 = vadd.f32 %v1033_v55, %v3213_v25  ;;  %v1083_v9 = vadd.f32 %v1074_v8, %v3216_v29  ;;  %v1035_v11 = vpop.f32.mrb[21].mxu0  ;;  %v1076_v10 = vpop.f32.mrb[21].mxu1 }
 0x299   : > { %v1082_v12 = vadd.f32 %v1035_v11, %v3218_v37  ;;  %v1084_v13 = vadd.f32 %v1076_v10, %v3221_v40  ;;  %v1037_v15 = vpop.f32.mrb[22].mxu0  ;;  %v1078_v17 = vpop.f32.mrb[22].mxu1 }
 0x29a   : > { %v2169_v47 = vmul.f32 -1.442695, %v1081_v7  ;;  %v1038_v48 = vpop.f32.mrb[23].mxu0  ;;  %v1079_v0 = vpop.f32.mrb[23].mxu1 }
 0x29b   : > { %v2170_v63 = vmul.f32 -1.442695, %v1082_v12  ;;  %v2171_v36 = vmul.f32 -1.442695, %v1084_v13  ;;  %v1112_v8 = vpop.permute.xlu0 %1111  ;;  %v997_v13 = vsel %vm995_vm6, %v3292_v18, 0.0 }
 0x29c   : > { %2409 = vpow2.f32 %v2169_v47  ;;  %vm1113_vm12 = vcmp.eq.s32.totalorder %v1112_v8, 1  ;;  %v1230_v8 = vpop.permute.xlu1 %1229 }
 0x29d   : > { %2411 = vpow2.f32 %v2170_v63  ;;  %v3785_v63 = vld [vmem:[#allocation20_spill] sm:$0xff]  ;;  %vm1231_vm13 = vcmp.eq.s32.totalorder %v1230_v8, 1 }
 0x29e   : > { %2413 = vpow2.f32 %v2171_v36 }
 0x29f   : > { %2415 = vtanh.f32 %v1083_v9 }
 0x2a6   : > { %v2410_v61 = vpop.eup %2409 }
 0x2a7   : > { %v2412_v4 = vpop.eup %2411  ;;  %v1088_v25 = vadd.f32 1.0, %v2410_v61  ;;  %v3786_v61 = vld [vmem:[#allocation21_spill] sm:$0xff] }
 0x2a8   : > { %v1094_v29 = vadd.f32 1.0, %v2412_v4  ;;  %v2414_v37 = vpop.eup %2413 }
 0x2a9   : > { %2417 = vrcp.f32 %v1088_v25  ;;  %v2416_v49 = vpop.eup %2415  ;;  %v1101_v26 = vadd.f32 1.0, %v2414_v37 }
 0x2aa   : > { %2419 = vrcp.f32 %v1094_v29 }
 0x2ab   : > { %2421 = vrcp.f32 %v1101_v26 }
 0x2b3   : > { %v2418_v40 = vpop.eup %2417 }
 0x2b4   : > { %v2420_v1 = vpop.eup %2419  ;;  %v1105_v6 = vmul.f32 %v2418_v40, %v2416_v49 }
 0x2b5   : > { %v1104_v55 = vmul.f32 %v2420_v1, %v996_v2  ;;  %v2422_v11 = vpop.eup %2421 }
 0x2b7   : > { %v1106_v7 = vadd.f32 %v1105_v6, %v1104_v55 }
 0x2b9   : > { %2423 = vtanh.f32 %v1106_v7  ;;  %v3349_v9 = vsel %vm1113_vm12, %v1106_v7, %v996_v2 }
 0x2c3   : > { %v2424_v10 = vpop.eup %2423 }
 0x2c4   : > { %v1108_v12 = vmul.f32 %v2424_v10, %v2422_v11 }
 0x2c6   : > { %v3354_v15 = vsel %vm1113_vm12, %v1108_v12, %v997_v13 }
 0x2c7   : > { %v1116_v62 = vpack.c.bf16 %v3354_v15, %v3354_v15 }
 0x2c9   : > { %1150 = vmatmul.mubr.bf16.vlgmr.msra.gmra.mrb[24].mxu0 %v1116_v62  ;;  %1191 = vmatmul.mubr.bf16.vlgmr.msra.gmra.mrb[24].mxu1 %v1116_v62 }
 0x2ca   : > { %1236 = vmatpush1.bf16.msra.mxu0 %v3033_v19  ;;  %1277 = vmatpush1.bf16.msra.mxu1 %v3035_v20 }
 0x2cb   : > { %1237 = vmatprep.subr.bf16.mxu0 %v3039_v21  ;;  %1278 = vmatprep.subr.bf16.mxu1 %v3041_v22 }
 0x2cc   : > { %1267 = vmatprep.mubr.bf16.mxu0 %v3784_v5  ;;  %1308 = vmatprep.mubr.bf16.mxu1 %v3784_v5 }
 0x2ce   : > { %1238 = vmatpush1.bf16.msra.mxu0 %v3043_v23  ;;  %1279 = vmatpush1.bf16.msra.mxu1 %v3045_v24 }
 0x2cf   : > { %1239 = vmatprep.subr.bf16.mxu0 %v3053_v27  ;;  %1280 = vmatprep.subr.bf16.mxu1 %v3057_v28 }
 0x2d2   : > { %1240 = vmatpush1.bf16.msra.mxu0 %v3062_v30  ;;  %1281 = vmatpush1.bf16.msra.mxu1 %v3064_v31 }
 0x2d3   : > { %1241 = vmatprep.subr.bf16.mxu0 %v3068_v32  ;;  %1282 = vmatprep.subr.bf16.mxu1 %v3072_v33 }
 0x2d6   : > { %1242 = vmatpush1.bf16.msra.mxu0 %v3075_v34  ;;  %1283 = vmatpush1.bf16.msra.mxu1 %v3079_v35 }
 0x2d7   : > { %1243 = vmatprep.subr.bf16.mxu0 %v3087_v38  ;;  %1284 = vmatprep.subr.bf16.mxu1 %v3089_v39 }
 0x2da   : > { %1244 = vmatpush1.bf16.msra.mxu0 %v3093_v41  ;;  %1285 = vmatpush1.bf16.msra.mxu1 %v3097_v42 }
 0x2db   : > { %1245 = vmatprep.subr.bf16.mxu0 %v3099_v43  ;;  %1286 = vmatprep.subr.bf16.mxu1 %v3106_v44 }
 0x2de   : > { %1246 = vmatpush1.bf16.msra.mxu0 %v3108_v45  ;;  %1287 = vmatpush1.bf16.msra.mxu1 %v3112_v46 }
 0x2df   : > { %1247 = vmatprep.subr.bf16.mxu0 %v3120_v50  ;;  %1288 = vmatprep.subr.bf16.mxu1 %v3125_v51 }
 0x2e2   : > { %1248 = vmatpush1.bf16.msra.mxu0 %v3131_v53  ;;  %1289 = vmatpush1.bf16.msra.mxu1 %v3133_v54 }
 0x2e3   : > { %1249 = vmatprep.subr.bf16.mxu0 %v3135_v56  ;;  %1290 = vmatprep.subr.bf16.mxu1 %v3137_v57 }
 0x2e6   : > { %1250 = vmatpush1.bf16.msra.mxu0 %v3147_v58  ;;  %1291 = vmatpush1.bf16.msra.mxu1 %v3149_v59 }
 0x2e7   : > { %1353 = vmatprep.subr.bf16.mxu0 %v3025_v14  ;;  %1394 = vmatprep.subr.bf16.mxu1 %v3029_v16 }
 0x39c   : > { %v1151_v3 = vpop.f32.mrb[24].mxu0  ;;  %v1192_v18 = vpop.f32.mrb[24].mxu1 }
 0x39d   : > { %v1199_v17 = vadd.f32 %v1151_v3, %v3223_v52  ;;  %v1201_v47 = vadd.f32 %v1192_v18, %v3226_v60  ;;  %v1153_v48 = vpop.f32.mrb[25].mxu0  ;;  %v1194_v0 = vpop.f32.mrb[25].mxu1 }
 0x39e   : > { %v1200_v36 = vadd.f32 %v1153_v48, %v3785_v63  ;;  %v1202_v4 = vadd.f32 %v1194_v0, %v3786_v61  ;;  %v1155_v25 = vpop.f32.mrb[26].mxu0  ;;  %v1196_v29 = vpop.f32.mrb[26].mxu1 }
 0x39f   : > { %v2172_v37 = vmul.f32 -1.442695, %v1199_v17  ;;  %v1156_v49 = vpop.f32.mrb[27].mxu0  ;;  %v1197_v40 = vpop.f32.mrb[27].mxu1 }
 0x3a0   : > { %v2173_v14 = vmul.f32 -1.442695, %v1200_v36  ;;  %v2174_v16 = vmul.f32 -1.442695, %v1202_v4 }
 0x3a1   : > { %2425 = vpow2.f32 %v2172_v37 }
 0x3a2   : > { %2427 = vpow2.f32 %v2173_v14 }
 0x3a3   : > { %2429 = vpow2.f32 %v2174_v16 }
 0x3a4   : > { %2431 = vtanh.f32 %v1201_v47 }
 0x3ab   : > { %v2426_v1 = vpop.eup %2425 }
 0x3ac   : > { %v2428_v2 = vpop.eup %2427  ;;  %v1206_v52 = vadd.f32 1.0, %v2426_v1 }
 0x3ad   : > { %v1212_v60 = vadd.f32 1.0, %v2428_v2  ;;  %v2430_v6 = vpop.eup %2429 }
 0x3ae   : > { %2433 = vrcp.f32 %v1206_v52  ;;  %v2432_v26 = vpop.eup %2431  ;;  %v1219_v11 = vadd.f32 1.0, %v2430_v6  ;;  %v1348_v6 = vpop.permute.xlu1 %1347 }
 0x3af   : > { %2435 = vrcp.f32 %v1212_v60  ;;  %vm1349_vm14 = vcmp.eq.s32.totalorder %v1348_v6, 1  ;;  %v3550_v6 = vld [vmem:[#allocation8 + $0x8c] ss:$16 sps:$4 sm:$0xff]  }
 0x3b0   : > { %2437 = vrcp.f32 %v1219_v11 }
 0x3b8   : > { %v2434_v55 = vpop.eup %2433 }
 0x3b9   : > { %v2436_v7 = vpop.eup %2435  ;;  %v1223_v10 = vmul.f32 %v2434_v55, %v2432_v26 }
 0x3ba   : > { %v1222_v12 = vmul.f32 %v2436_v7, %v3349_v9  ;;  %v2438_v3 = vpop.eup %2437 }
 0x3bc   : > { %v1224_v13 = vadd.f32 %v1223_v10, %v1222_v12 }
 0x3be   : > { %2439 = vtanh.f32 %v1224_v13  ;;  %v3398_v62 = vsel %vm1231_vm13, %v1224_v13, %v3349_v9  ;;  %v3456_v13 = vld [vmem:[#allocation8] ss:$16 sps:$4 sm:$0xff]  }
 0x3c8   : > { %v2440_v18 = vpop.eup %2439 }
 0x3c9   : > { %v1226_v17 = vmul.f32 %v2440_v18, %v2438_v3  ;;  %v3459_v3 = vld [vmem:[#allocation8 + $0x8] ss:$16 sps:$4 sm:$0xff]   ;;  %v3465_v18 = vld [vmem:[#allocation8 + $0x2c] ss:$16 sps:$4 sm:$0xff]  }
 0x3cb   : > { %v3401_v47 = vsel %vm1231_vm13, %v1226_v17, %v3354_v15  ;;  %v3470_v17 = vld [vmem:[#allocation8 + $0x20] ss:$16 sps:$4 sm:$0xff]  }
 0x3cc   : > { %v1234_v48 = vpack.c.bf16 %v3401_v47, %v3401_v47 }
 0x3ce   : > { %1268 = vmatmul.mubr.bf16.vlgmr.msra.gmra.mrb[28].mxu0 %v1234_v48  ;;  %1309 = vmatmul.mubr.bf16.vlgmr.msra.gmra.mrb[28].mxu1 %v1234_v48  ;;  %v3476_v48 = vld [vmem:[#allocation8 + $0x44] ss:$16 sps:$4 sm:$0xff]  }
 0x3cf   : > { %1354 = vmatpush1.bf16.msra.mxu0 %v3033_v19  ;;  %1395 = vmatpush1.bf16.msra.mxu1 %v3035_v20  ;;  %v3437_v19 = vld [vmem:[#allocation8 + $0x4] ss:$16 sps:$4 sm:$0xff]   ;;  %v3440_v20 = vld [vmem:[#allocation8 + $0xc] ss:$16 sps:$4 sm:$0xff]  }
 0x3d0   : > { %1355 = vmatprep.subr.bf16.mxu0 %v3039_v21  ;;  %1396 = vmatprep.subr.bf16.mxu1 %v3041_v22 }
 0x3d1   : > { %1385 = vmatprep.mubr.bf16.mxu0 %v3784_v5  ;;  %1426 = vmatprep.mubr.bf16.mxu1 %v3784_v5 }
 0x3d3   : > { %1356 = vmatpush1.bf16.msra.mxu0 %v3043_v23  ;;  %1397 = vmatpush1.bf16.msra.mxu1 %v3045_v24  ;;  %v3787_v23 = vld [vmem:[#allocation22_spill] sm:$0xff] }
 0x3d4   : > { %1357 = vmatprep.subr.bf16.mxu0 %v3053_v27  ;;  %1398 = vmatprep.subr.bf16.mxu1 %v3057_v28  ;;  %v3788_v27 = vld [vmem:[#allocation23_spill] sm:$0xff] }
 0x3d7   : > { %1358 = vmatpush1.bf16.msra.mxu0 %v3062_v30  ;;  %1399 = vmatpush1.bf16.msra.mxu1 %v3064_v31 }
 0x3d8   : > { %1359 = vmatprep.subr.bf16.mxu0 %v3068_v32  ;;  %1400 = vmatprep.subr.bf16.mxu1 %v3072_v33  ;;  %v3789_v32 = vld [vmem:[#allocation24_spill] sm:$0xff] }
 0x3db   : > { %1360 = vmatpush1.bf16.msra.mxu0 %v3075_v34  ;;  %1401 = vmatpush1.bf16.msra.mxu1 %v3079_v35  ;;  %v3790_v34 = vld [vmem:[#allocation25_spill] sm:$0xff] }
 0x3dc   : > { %1361 = vmatprep.subr.bf16.mxu0 %v3087_v38  ;;  %1402 = vmatprep.subr.bf16.mxu1 %v3089_v39 }
 0x3df   : > { %1362 = vmatpush1.bf16.msra.mxu0 %v3093_v41  ;;  %1403 = vmatpush1.bf16.msra.mxu1 %v3097_v42 }
 0x3e0   : > { %1363 = vmatprep.subr.bf16.mxu0 %v3099_v43  ;;  %1404 = vmatprep.subr.bf16.mxu1 %v3106_v44 }
 0x3e3   : > { %1364 = vmatpush1.bf16.msra.mxu0 %v3108_v45  ;;  %1405 = vmatpush1.bf16.msra.mxu1 %v3112_v46 }
 0x3e4   : > { %1365 = vmatprep.subr.bf16.mxu0 %v3120_v50  ;;  %1406 = vmatprep.subr.bf16.mxu1 %v3125_v51 }
 0x3e7   : > { %1366 = vmatpush1.bf16.msra.mxu0 %v3131_v53  ;;  %1407 = vmatpush1.bf16.msra.mxu1 %v3133_v54 }
 0x3e8   : > { %1367 = vmatprep.subr.bf16.mxu0 %v3135_v56  ;;  %1408 = vmatprep.subr.bf16.mxu1 %v3137_v57 }
 0x3eb   : > { %1368 = vmatpush1.bf16.msra.mxu0 %v3147_v58  ;;  %1409 = vmatpush1.bf16.msra.mxu1 %v3149_v59 }
 0x3ec   : > { %1471 = vmatprep.subr.bf16.mxu0 %v3437_v19  ;;  %1512 = vmatprep.subr.bf16.mxu1 %v3440_v20 }
 0x4a1   : > { %v1269_v21 = vpop.f32.mrb[28].mxu0  ;;  %v1310_v22 = vpop.f32.mrb[28].mxu1 }
 0x4a2   : > { %v1317_v24 = vadd.f32 %v1269_v21, %v3787_v23  ;;  %v1319_v28 = vadd.f32 %v1310_v22, %v3788_v27  ;;  %v1271_v30 = vpop.f32.mrb[29].mxu0  ;;  %v1312_v31 = vpop.f32.mrb[29].mxu1  ;;  %v3479_v21 = vld [vmem:[#allocation8 + $0x4c] ss:$16 sps:$4 sm:$0xff]   ;;  %v3482_v22 = vld [vmem:[#allocation8 + $0x40] ss:$16 sps:$4 sm:$0xff]  }
 0x4a3   : > { %v1318_v33 = vadd.f32 %v1271_v30, %v3789_v32  ;;  %v1320_v35 = vadd.f32 %v1312_v31, %v3790_v34  ;;  %v1273_v9 = vpop.f32.mrb[30].mxu0  ;;  %v1314_v15 = vpop.f32.mrb[30].mxu1  ;;  %v3485_v23 = vld [vmem:[#allocation8 + $0x48] ss:$16 sps:$4 sm:$0xff]   ;;  %v3491_v27 = vld [vmem:[#allocation8 + $0x6c] ss:$16 sps:$4 sm:$0xff]  }
 0x4a4   : > { %v2175_v0 = vmul.f32 -1.442695, %v1317_v24  ;;  %v1274_v63 = vpop.f32.mrb[31].mxu0  ;;  %v1315_v36 = vpop.f32.mrb[31].mxu1  ;;  %v3488_v24 = vld [vmem:[#allocation8 + $0x64] ss:$16 sps:$4 sm:$0xff]  }
 0x4a5   : > { %v2176_v61 = vmul.f32 -1.442695, %v1318_v33  ;;  %v2177_v4 = vmul.f32 -1.442695, %v1320_v35  ;;  %v3497_v30 = vld [vmem:[#allocation8 + $0x68] ss:$16 sps:$4 sm:$0xff]  }
 0x4a6   : > { %2441 = vpow2.f32 %v2175_v0 }
 0x4a7   : > { %2443 = vpow2.f32 %v2176_v61 }
 0x4a8   : > { %2445 = vpow2.f32 %v2177_v4 }
 0x4a9   : > { %2447 = vtanh.f32 %v1319_v28  ;;  %v3494_v28 = vld [vmem:[#allocation8 + $0x60] ss:$16 sps:$4 sm:$0xff]  }
 0x4b0   : > { %v2442_v25 = vpop.eup %2441 }
 0x4b1   : > { %v2444_v29 = vpop.eup %2443  ;;  %v1324_v37 = vadd.f32 1.0, %v2442_v25 }
 0x4b2   : > { %v1330_v49 = vadd.f32 1.0, %v2444_v29  ;;  %v2446_v40 = vpop.eup %2445 }
 0x4b3   : > { %2449 = vrcp.f32 %v1324_v37  ;;  %v2448_v14 = vpop.eup %2447  ;;  %v1337_v52 = vadd.f32 1.0, %v2446_v40  ;;  %v1466_v37 = vpop.permute.xlu0 %1465 }
 0x4b4   : > { %2451 = vrcp.f32 %v1330_v49  ;;  %vm1467_vm15 = vcmp.eq.s32.totalorder %v1466_v37, 1 }
 0x4b5   : > { %2453 = vrcp.f32 %v1337_v52 }
 0x4bd   : > { %v2450_v16 = vpop.eup %2449 }
 0x4be   : > { %v2452_v1 = vpop.eup %2451  ;;  %v1341_v2 = vmul.f32 %v2450_v16, %v2448_v14 }
 0x4bf   : > { %v1340_v60 = vmul.f32 %v2452_v1, %v3398_v62  ;;  %v2454_v8 = vpop.eup %2453 }
 0x4c1   : > { %v1342_v26 = vadd.f32 %v1341_v2, %v1340_v60  ;;  %v3547_v60 = vld [vmem:[#allocation8 + $0x84] ss:$16 sps:$4 sm:$0xff]  }
 0x4c3   : > { %2455 = vtanh.f32 %v1342_v26  ;;  %v3449_v55 = vsel %vm1349_vm14, %v1342_v26, %v3398_v62  ;;  %v3462_v62 = vld [vmem:[#allocation8 + $0x24] ss:$16 sps:$4 sm:$0xff]   ;;  %v3553_v26 = vld [vmem:[#allocation8 + $0x80] ss:$16 sps:$4 sm:$0xff]  }
 0x4cd   : > { %v2456_v7 = vpop.eup %2455 }
 0x4ce   : > { %v1344_v11 = vmul.f32 %v2456_v7, %v2454_v8  ;;  %v3559_v8 = vld [vmem:[#allocation8 + $0xa4] ss:$16 sps:$4 sm:$0xff]   ;;  %v3562_v7 = vld [vmem:[#allocation8 + $0xac] ss:$16 sps:$4 sm:$0xff]  }
 0x4d0   : > { %v3452_v10 = vsel %vm1349_vm14, %v1344_v11, %v3401_v47  ;;  %v3473_v47 = vld [vmem:[#allocation8 + $0x28] ss:$16 sps:$4 sm:$0xff]   ;;  %v3565_v11 = vld [vmem:[#allocation8 + $0xa0] ss:$16 sps:$4 sm:$0xff]  }
 0x4d1   : > { %v1352_v12 = vpack.c.bf16 %v3452_v10, %v3452_v10 }
 0x4d3   : > { %1386 = vmatmul.mubr.bf16.vlgmr.msra.gmra.mrb[32].mxu0 %v1352_v12  ;;  %1427 = vmatmul.mubr.bf16.vlgmr.msra.gmra.mrb[32].mxu1 %v1352_v12  ;;  %v3571_v12 = vld [vmem:[#allocation8 + $0xc4] ss:$16 sps:$4 sm:$0xff]  }
 0x4d4   : > { %1472 = vmatpush1.bf16.msra.mxu0 %v3456_v13  ;;  %1513 = vmatpush1.bf16.msra.mxu1 %v3459_v3 }
 0x4d5   : > { %1473 = vmatprep.subr.bf16.mxu0 %v3462_v62  ;;  %1514 = vmatprep.subr.bf16.mxu1 %v3465_v18 }
 0x4d6   : > { %1503 = vmatprep.mubr.bf16.mxu0 %v3784_v5  ;;  %1544 = vmatprep.mubr.bf16.mxu1 %v3784_v5 }
 0x4d8   : > { %1474 = vmatpush1.bf16.msra.mxu0 %v3470_v17  ;;  %1515 = vmatpush1.bf16.msra.mxu1 %v3473_v47 }
 0x4d9   : > { %1475 = vmatprep.subr.bf16.mxu0 %v3476_v48  ;;  %1516 = vmatprep.subr.bf16.mxu1 %v3479_v21 }
 0x4dc   : > { %1476 = vmatpush1.bf16.msra.mxu0 %v3482_v22  ;;  %1517 = vmatpush1.bf16.msra.mxu1 %v3485_v23 }
 0x4dd   : > { %1477 = vmatprep.subr.bf16.mxu0 %v3488_v24  ;;  %1518 = vmatprep.subr.bf16.mxu1 %v3491_v27 }
 0x4e0   : > { %1478 = vmatpush1.bf16.msra.mxu0 %v3494_v28  ;;  %1519 = vmatpush1.bf16.msra.mxu1 %v3497_v30 }
 0x4e1   : > { %1479 = vmatprep.subr.bf16.mxu0 %v3087_v38  ;;  %1520 = vmatprep.subr.bf16.mxu1 %v3089_v39 }
 0x4e4   : > { %1480 = vmatpush1.bf16.msra.mxu0 %v3093_v41  ;;  %1521 = vmatpush1.bf16.msra.mxu1 %v3097_v42  ;;  %v3791_v41 = vld [vmem:[#allocation26_spill] sm:$0xff] }
 0x4e5   : > { %1481 = vmatprep.subr.bf16.mxu0 %v3099_v43  ;;  %1522 = vmatprep.subr.bf16.mxu1 %v3106_v44  ;;  %v3792_v43 = vld [vmem:[#allocation27_spill] sm:$0xff] }
 0x4e8   : > { %1482 = vmatpush1.bf16.msra.mxu0 %v3108_v45  ;;  %1523 = vmatpush1.bf16.msra.mxu1 %v3112_v46 }
 0x4e9   : > { %1483 = vmatprep.subr.bf16.mxu0 %v3120_v50  ;;  %1524 = vmatprep.subr.bf16.mxu1 %v3125_v51  ;;  %v3793_v50 = vld [vmem:[#allocation28_spill] sm:$0xff] }
 0x4ec   : > { %1484 = vmatpush1.bf16.msra.mxu0 %v3131_v53  ;;  %1525 = vmatpush1.bf16.msra.mxu1 %v3133_v54  ;;  %v3794_v53 = vld [vmem:[#allocation29_spill] sm:$0xff] }
 0x4ed   : > { %1485 = vmatprep.subr.bf16.mxu0 %v3135_v56  ;;  %1526 = vmatprep.subr.bf16.mxu1 %v3137_v57 }
 0x4f0   : > { %1486 = vmatpush1.bf16.msra.mxu0 %v3147_v58  ;;  %1527 = vmatpush1.bf16.msra.mxu1 %v3149_v59 }
 0x4f1   : > { %1589 = vmatprep.subr.bf16.mxu0 %v3437_v19  ;;  %1630 = vmatprep.subr.bf16.mxu1 %v3440_v20 }
 0x5a6   : > { %v1387_v38 = vpop.f32.mrb[32].mxu0  ;;  %v1428_v39 = vpop.f32.mrb[32].mxu1 }
 0x5a7   : > { %v1435_v42 = vadd.f32 %v1387_v38, %v3791_v41  ;;  %v1437_v44 = vadd.f32 %v1428_v39, %v3792_v43  ;;  %v1389_v45 = vpop.f32.mrb[33].mxu0  ;;  %v1430_v46 = vpop.f32.mrb[33].mxu1  ;;  %v3574_v38 = vld [vmem:[#allocation8 + $0xcc] ss:$16 sps:$4 sm:$0xff]   ;;  %v3577_v39 = vld [vmem:[#allocation8 + $0xc0] ss:$16 sps:$4 sm:$0xff]  }
 0x5a8   : > { %v1436_v51 = vadd.f32 %v1389_v45, %v3793_v50  ;;  %v1438_v54 = vadd.f32 %v1430_v46, %v3794_v53  ;;  %v1391_v56 = vpop.f32.mrb[34].mxu0  ;;  %v1432_v57 = vpop.f32.mrb[34].mxu1  ;;  %v3580_v41 = vld [vmem:[#allocation8 + $0xc8] ss:$16 sps:$4 sm:$0xff]   ;;  %v3586_v43 = vld [vmem:[#allocation8 + $0xec] ss:$16 sps:$4 sm:$0xff]  }
 0x5a9   : > { %v2178_v58 = vmul.f32 -1.442695, %v1435_v42  ;;  %v1392_v59 = vpop.f32.mrb[35].mxu0  ;;  %v1433_v31 = vpop.f32.mrb[35].mxu1  ;;  %v3583_v42 = vld [vmem:[#allocation8 + $0xe4] ss:$16 sps:$4 sm:$0xff]  }
 0x5aa   : > { %v2179_v32 = vmul.f32 -1.442695, %v1436_v51  ;;  %v2180_v33 = vmul.f32 -1.442695, %v1438_v54  ;;  %v3592_v45 = vld [vmem:[#allocation8 + $0xe8] ss:$16 sps:$4 sm:$0xff]  }
 0x5ab   : > { %2457 = vpow2.f32 %v2178_v58  ;;  %v3795_v51 = vld [vmem:[#allocation30_spill] sm:$0xff]  ;;  %v3796_v54 = vld [vmem:[#allocation31_spill] sm:$0xff]  ;;  %v3797_v59 = vld [vmem:[#allocation32_spill] sm:$0xff] }
 0x5ac   : > { %2459 = vpow2.f32 %v2179_v32  ;;  %v3798_v32 = vld [vmem:[#allocation33_spill] sm:$0xff] }
 0x5ad   : > { %2461 = vpow2.f32 %v2180_v33 }
 0x5ae   : > { %2463 = vtanh.f32 %v1437_v44  ;;  %v3589_v44 = vld [vmem:[#allocation8 + $0xe0] ss:$16 sps:$4 sm:$0xff]  }
 0x5b5   : > { %v2458_v34 = vpop.eup %2457 }
 0x5b6   : > { %v2460_v35 = vpop.eup %2459  ;;  %v1442_v9 = vadd.f32 1.0, %v2458_v34 }
 0x5b7   : > { %v1448_v15 = vadd.f32 1.0, %v2460_v35  ;;  %v2462_v0 = vpop.eup %2461 }
 0x5b8   : > { %2465 = vrcp.f32 %v1442_v9  ;;  %v2464_v63 = vpop.eup %2463  ;;  %v1455_v25 = vadd.f32 1.0, %v2462_v0 }
 0x5b9   : > { %2467 = vrcp.f32 %v1448_v15 }
 0x5ba   : > { %2469 = vrcp.f32 %v1455_v25 }
 0x5c2   : > { %v2466_v36 = vpop.eup %2465 }
 0x5c3   : > { %v2468_v61 = vpop.eup %2467  ;;  %v1459_v4 = vmul.f32 %v2466_v36, %v2464_v63 }
 0x5c4   : > { %v1458_v29 = vmul.f32 %v2468_v61, %v3449_v55  ;;  %v2470_v14 = vpop.eup %2469 }
 0x5c6   : > { %v1460_v49 = vadd.f32 %v1459_v4, %v1458_v29 }
 0x5c8   : > { %2471 = vtanh.f32 %v1460_v49  ;;  %v3524_v40 = vsel %vm1467_vm15, %v1460_v49, %v3449_v55  ;;  %v3556_v55 = vld [vmem:[#allocation8 + $0x88] ss:$16 sps:$4 sm:$0xff]  }
 0x5d2   : > { %v2472_v16 = vpop.eup %2471 }
 0x5d3   : > { %v1462_v1 = vmul.f32 %v2472_v16, %v2470_v14 }
 0x5d5   : > { %v3527_v2 = vsel %vm1467_vm15, %v1462_v1, %v3452_v10  ;;  %v3568_v10 = vld [vmem:[#allocation8 + $0xa8] ss:$16 sps:$4 sm:$0xff]  }
 0x5d6   : > { %v1470_v52 = vpack.c.bf16 %v3527_v2, %v3527_v2 }
 0x5d8   : > { %1504 = vmatmul.mubr.bf16.vlgmr.msra.gmra.mrb[36].mxu0 %v1470_v52  ;;  %1545 = vmatmul.mubr.bf16.vlgmr.msra.gmra.mrb[36].mxu1 %v1470_v52  ;;  %v1584_v52 = vpop.permute.xlu1 %1583 }
 0x5d9   : > { %1590 = vmatpush1.bf16.msra.mxu0 %v3456_v13  ;;  %1631 = vmatpush1.bf16.msra.mxu1 %v3459_v3  ;;  %vm1585_vm0 = vcmp.eq.s32.totalorder %v1584_v52, 1 }
 0x5da   : > { %1591 = vmatprep.subr.bf16.mxu0 %v3462_v62  ;;  %1632 = vmatprep.subr.bf16.mxu1 %v3465_v18 }
 0x5db   : > { %1621 = vmatprep.mubr.bf16.mxu0 %v3784_v5  ;;  %1662 = vmatprep.mubr.bf16.mxu1 %v3784_v5 }
 0x5dd   : > { %1592 = vmatpush1.bf16.msra.mxu0 %v3470_v17  ;;  %1633 = vmatpush1.bf16.msra.mxu1 %v3473_v47 }
 0x5de   : > { %1593 = vmatprep.subr.bf16.mxu0 %v3476_v48  ;;  %1634 = vmatprep.subr.bf16.mxu1 %v3479_v21 }
 0x5e1   : > { %1594 = vmatpush1.bf16.msra.mxu0 %v3482_v22  ;;  %1635 = vmatpush1.bf16.msra.mxu1 %v3485_v23 }
 0x5e2   : > { %1595 = vmatprep.subr.bf16.mxu0 %v3488_v24  ;;  %1636 = vmatprep.subr.bf16.mxu1 %v3491_v27 }
 0x5e5   : > { %1596 = vmatpush1.bf16.msra.mxu0 %v3494_v28  ;;  %1637 = vmatpush1.bf16.msra.mxu1 %v3497_v30 }
 0x5e6   : > { %1597 = vmatprep.subr.bf16.mxu0 %v3547_v60  ;;  %1638 = vmatprep.subr.bf16.mxu1 %v3550_v6 }
 0x5e9   : > { %1598 = vmatpush1.bf16.msra.mxu0 %v3553_v26  ;;  %1639 = vmatpush1.bf16.msra.mxu1 %v3556_v55 }
 0x5ea   : > { %1599 = vmatprep.subr.bf16.mxu0 %v3559_v8  ;;  %1640 = vmatprep.subr.bf16.mxu1 %v3562_v7 }
 0x5ed   : > { %1600 = vmatpush1.bf16.msra.mxu0 %v3565_v11  ;;  %1641 = vmatpush1.bf16.msra.mxu1 %v3568_v10 }
 0x5ee   : > { %1601 = vmatprep.subr.bf16.mxu0 %v3571_v12  ;;  %1642 = vmatprep.subr.bf16.mxu1 %v3574_v38 }
 0x5f1   : > { %1602 = vmatpush1.bf16.msra.mxu0 %v3577_v39  ;;  %1643 = vmatpush1.bf16.msra.mxu1 %v3580_v41 }
 0x5f2   : > { %1603 = vmatprep.subr.bf16.mxu0 %v3583_v42  ;;  %1644 = vmatprep.subr.bf16.mxu1 %v3586_v43 }
 0x5f5   : > { %1604 = vmatpush1.bf16.msra.mxu0 %v3589_v44  ;;  %1645 = vmatpush1.bf16.msra.mxu1 %v3592_v45 }
 0x5f6   : > { %1707 = vmatprep.subr.bf16.mxu0 %v3437_v19  ;;  %1748 = vmatprep.subr.bf16.mxu1 %v3440_v20 }
 0x6ab   : > { %v1505_v46 = vpop.f32.mrb[36].mxu0  ;;  %v1546_v50 = vpop.f32.mrb[36].mxu1 }
 0x6ac   : > { %v1553_v53 = vadd.f32 %v1505_v46, %v3795_v51  ;;  %v1555_v56 = vadd.f32 %v1546_v50, %v3796_v54  ;;  %v1507_v57 = vpop.f32.mrb[37].mxu0  ;;  %v1548_v58 = vpop.f32.mrb[37].mxu1 }
 0x6ad   : > { %v1554_v31 = vadd.f32 %v1507_v57, %v3797_v59  ;;  %v1556_v33 = vadd.f32 %v1548_v58, %v3798_v32  ;;  %v1509_v34 = vpop.f32.mrb[38].mxu0  ;;  %v1550_v35 = vpop.f32.mrb[38].mxu1 }
 0x6ae   : > { %v2181_v9 = vmul.f32 -1.442695, %v1553_v53  ;;  %v1510_v15 = vpop.f32.mrb[39].mxu0  ;;  %v1551_v0 = vpop.f32.mrb[39].mxu1  ;;  %v2385_v34 = vld [vmem:[#allocation9] sm:$0xff]   ;;  %v2758_v35 = vmov 0.0  }
 0x6af   : > { %v2182_v19 = vmul.f32 -1.442695, %v1554_v31  ;;  %v2183_v20 = vmul.f32 -1.442695, %v1556_v33  ;;  %v2387_v15 = vld [vmem:[#allocation9 + $0x10] sm:$0xff]   ;;  %v2388_v0 = vld [vmem:[#allocation9 + $0x18] sm:$0xff]  }
 0x6b0   : > { %2473 = vpow2.f32 %v2181_v9  ;;  %v2386_v9 = vld [vmem:[#allocation9 + $0x8] sm:$0xff]  }
 0x6b1   : > { %2475 = vpow2.f32 %v2182_v19  ;;  %v2389_v19 = vld [vmem:[#allocation9 + $0x20] sm:$0xff]  }
 0x6b2   : > { %2477 = vpow2.f32 %v2183_v20  ;;  %v2390_v20 = vld [vmem:[#allocation9 + $0x28] sm:$0xff]  }
 0x6b3   : > { %2479 = vtanh.f32 %v1555_v56 }
 0x6ba   : > { %v2474_v63 = vpop.eup %2473 }
 0x6bb   : > { %v2476_v36 = vpop.eup %2475  ;;  %v1560_v61 = vadd.f32 1.0, %v2474_v63  ;;  %v2391_v63 = vld [vmem:[#allocation9 + $0x30] sm:$0xff]  }
 0x6bc   : > { %v1566_v4 = vadd.f32 1.0, %v2476_v36  ;;  %v2478_v25 = vpop.eup %2477  ;;  %v2392_v36 = vld [vmem:[#allocation9 + $0x38] sm:$0xff]  }
 0x6bd   : > { %2481 = vrcp.f32 %v1560_v61  ;;  %v2480_v29 = vpop.eup %2479  ;;  %v1573_v16 = vadd.f32 1.0, %v2478_v25  ;;  %v3803_v25 = vld [vmem:[#allocation38_spill] sm:$0xff] }
 0x6be   : > { %2483 = vrcp.f32 %v1566_v4 }
 0x6bf   : > { %2485 = vrcp.f32 %v1573_v16 }
 0x6c7   : > { %v2482_v37 = vpop.eup %2481 }
 0x6c8   : > { %v2484_v49 = vpop.eup %2483  ;;  %v1577_v14 = vmul.f32 %v2482_v37, %v2480_v29  ;;  %v3804_v37 = vld [vmem:[#allocation39_spill] sm:$0xff] }
 0x6c9   : > { %v1576_v1 = vmul.f32 %v2484_v49, %v3524_v40  ;;  %v2486_v51 = vpop.eup %2485 }
 0x6cb   : > { %v1578_v46 = vadd.f32 %v1577_v14, %v1576_v1  ;;  %v3805_v1 = vld [vmem:[#allocation40_spill] sm:$0xff] }
 0x6cd   : > { %2487 = vtanh.f32 %v1578_v46  ;;  %v3603_v50 = vsel %vm1585_vm0, %v1578_v46, %v3524_v40  ;;  %v3806_v46 = vld [vmem:[#allocation41_spill] sm:$0xff] }
 0x6d7   : > { %v2488_v53 = vpop.eup %2487 }
 0x6d8   : > { %v1580_v54 = vmul.f32 %v2488_v53, %v2486_v51 }
 0x6da   : > { %v3606_v56 = vsel %vm1585_vm0, %v1580_v54, %v3527_v2 }
 0x6db   : > { %v1588_v57 = vpack.c.bf16 %v3606_v56, %v3606_v56 }
 0x6dd   : > { %1622 = vmatmul.mubr.bf16.vlgmr.msra.gmra.mrb[40].mxu0 %v1588_v57  ;;  %1663 = vmatmul.mubr.bf16.vlgmr.msra.gmra.mrb[40].mxu1 %v1588_v57 }
 0x6de   : > { %1708 = vmatpush1.bf16.msra.mxu0 %v3456_v13  ;;  %1749 = vmatpush1.bf16.msra.mxu1 %v3459_v3  ;;  %v3799_v3 = vld [vmem:[#allocation34_spill] sm:$0xff] }
 0x6df   : > { %1709 = vmatprep.subr.bf16.mxu0 %v3462_v62  ;;  %1750 = vmatprep.subr.bf16.mxu1 %v3465_v18  ;;  %v3800_v18 = vld [vmem:[#allocation35_spill] sm:$0xff] }
 0x6e0   : > { %1739 = vmatprep.mubr.bf16.mxu0 %v3784_v5  ;;  %1780 = vmatprep.mubr.bf16.mxu1 %v3784_v5 }
 0x6e2   : > { %1710 = vmatpush1.bf16.msra.mxu0 %v3470_v17  ;;  %1751 = vmatpush1.bf16.msra.mxu1 %v3473_v47 }
 0x6e3   : > { %1711 = vmatprep.subr.bf16.mxu0 %v3476_v48  ;;  %1752 = vmatprep.subr.bf16.mxu1 %v3479_v21  ;;  %v3801_v21 = vld [vmem:[#allocation36_spill] sm:$0xff] }
 0x6e6   : > { %1712 = vmatpush1.bf16.msra.mxu0 %v3482_v22  ;;  %1753 = vmatpush1.bf16.msra.mxu1 %v3485_v23  ;;  %v3802_v23 = vld [vmem:[#allocation37_spill] sm:$0xff] }
 0x6e7   : > { %1713 = vmatprep.subr.bf16.mxu0 %v3488_v24  ;;  %1754 = vmatprep.subr.bf16.mxu1 %v3491_v27 }
 0x6ea   : > { %1714 = vmatpush1.bf16.msra.mxu0 %v3494_v28  ;;  %1755 = vmatpush1.bf16.msra.mxu1 %v3497_v30 }
 0x6eb   : > { %1715 = vmatprep.subr.bf16.mxu0 %v3547_v60  ;;  %1756 = vmatprep.subr.bf16.mxu1 %v3550_v6 }
 0x6ee   : > { %1716 = vmatpush1.bf16.msra.mxu0 %v3553_v26  ;;  %1757 = vmatpush1.bf16.msra.mxu1 %v3556_v55 }
 0x6ef   : > { %1717 = vmatprep.subr.bf16.mxu0 %v3559_v8  ;;  %1758 = vmatprep.subr.bf16.mxu1 %v3562_v7 }
 0x6f2   : > { %1718 = vmatpush1.bf16.msra.mxu0 %v3565_v11  ;;  %1759 = vmatpush1.bf16.msra.mxu1 %v3568_v10 }
 0x6f3   : > { %1719 = vmatprep.subr.bf16.mxu0 %v3571_v12  ;;  %1760 = vmatprep.subr.bf16.mxu1 %v3574_v38 }
 0x6f6   : > { %1720 = vmatpush1.bf16.msra.mxu0 %v3577_v39  ;;  %1761 = vmatpush1.bf16.msra.mxu1 %v3580_v41 }
 0x6f7   : > { %1721 = vmatprep.subr.bf16.mxu0 %v3583_v42  ;;  %1762 = vmatprep.subr.bf16.mxu1 %v3586_v43  ;;  %v1702_v42 = vpop.permute.xlu0 %1701 }
 0x6f8   : > { %vm1703_vm1 = vcmp.eq.s32.totalorder %v1702_v42, 1  ;;  %v2200_v42 = vld [vmem:[#allocation2] ss:$0 sm:$0xff] }
 0x6fa   : > { %1722 = vmatpush1.bf16.msra.mxu0 %v3589_v44  ;;  %1763 = vmatpush1.bf16.msra.mxu1 %v3592_v45 }
 0x6fb   : > { %2219 = vmatprep.subr.bf16.mxu0 %v2758_v35 }
 0x7b0   : > { %v1623_v5 = vpop.f32.mrb[40].mxu0  ;;  %v1664_v13 = vpop.f32.mrb[40].mxu1 }
 0x7b1   : > { %v1671_v62 = vadd.f32 %v1623_v5, %v3799_v3  ;;  %v1673_v17 = vadd.f32 %v1664_v13, %v3800_v18  ;;  %v1625_v47 = vpop.f32.mrb[41].mxu0  ;;  %v1666_v48 = vpop.f32.mrb[41].mxu1 }
 0x7b2   : > { %v1672_v22 = vadd.f32 %v1625_v47, %v3801_v21  ;;  %v1674_v24 = vadd.f32 %v1666_v48, %v3802_v23  ;;  %v1627_v27 = vpop.f32.mrb[42].mxu0  ;;  %v1668_v28 = vpop.f32.mrb[42].mxu1 }
 0x7b3   : > { %v2184_v30 = vmul.f32 -1.442695, %v1671_v62  ;;  %v1628_v40 = vpop.f32.mrb[43].mxu0  ;;  %v1669_v2 = vpop.f32.mrb[43].mxu1 }
 0x7b4   : > { %v2185_v60 = vmul.f32 -1.442695, %v1672_v22  ;;  %v2186_v6 = vmul.f32 -1.442695, %v1674_v24  ;;  %v1820_v40 = vpop.permute.xlu1 %1819 }
 0x7b5   : > { %2489 = vpow2.f32 %v2184_v30  ;;  %vm1821_vm3 = vcmp.eq.s32.totalorder %v1820_v40, 1 }
 0x7b6   : > { %2491 = vpow2.f32 %v2185_v60 }
 0x7b7   : > { %2493 = vpow2.f32 %v2186_v6 }
 0x7b8   : > { %2495 = vtanh.f32 %v1673_v17 }
 0x7bf   : > { %v2490_v26 = vpop.eup %2489 }
 0x7c0   : > { %v2492_v55 = vpop.eup %2491  ;;  %v1678_v8 = vadd.f32 1.0, %v2490_v26 }
 0x7c1   : > { %v1684_v7 = vadd.f32 1.0, %v2492_v55  ;;  %v2494_v11 = vpop.eup %2493  ;;  %v2190_v55 = vld [vmem:[%s3722_s6] ss:$0 sm:$0xff] }
 0x7c2   : > { %2497 = vrcp.f32 %v1678_v8  ;;  %v2496_v10 = vpop.eup %2495  ;;  %v1691_v41 = vadd.f32 1.0, %v2494_v11 }
 0x7c3   : > { %2499 = vrcp.f32 %v1684_v7 }
 0x7c4   : > { %2501 = vrcp.f32 %v1691_v41 }
 0x7cc   : > { %v2498_v12 = vpop.eup %2497 }
 0x7cd   : > { %v2500_v38 = vpop.eup %2499  ;;  %v1695_v39 = vmul.f32 %v2498_v12, %v2496_v10  ;;  %v2199_v12 = vld [vmem:[%s3723_s7] ss:$0 sm:$0xff] }
 0x7ce   : > { %v1694_v43 = vmul.f32 %v2500_v38, %v3603_v50  ;;  %v2502_v58 = vpop.eup %2501 }
 0x7d0   : > { %v1696_v44 = vadd.f32 %v1695_v39, %v1694_v43 }
 0x7d2   : > { %2503 = vtanh.f32 %v1696_v44  ;;  %v3648_v45 = vsel %vm1703_vm1, %v1696_v44, %v3603_v50 }
 0x7dc   : > { %v2504_v59 = vpop.eup %2503 }
 0x7dd   : > { %v1698_v31 = vmul.f32 %v2504_v59, %v2502_v58 }
 0x7df   : > { %v3651_v32 = vsel %vm1703_vm1, %v1698_v31, %v3606_v56 }
 0x7e0   : > { %v1706_v33 = vpack.c.bf16 %v3651_v32, %v3651_v32 }
 0x7e2   : > { %1740 = vmatmul.mubr.bf16.vlgmr.msra.gmra.mrb[44].mxu0 %v1706_v33  ;;  %1781 = vmatmul.mubr.bf16.vlgmr.msra.gmra.mrb[44].mxu1 %v1706_v33 }
 0x7e3   : > { %2220 = vmatpush3.bf16.msra.mxu0 %v2385_v34  ;;  %2235 = vmatprep.mubr.msk.bf16.mxu0 %vm2759_vm2, %v2758_v35 }
 0x7e4   : > { %2221 = vmatprep.subr.bf16.mxu0 %v2758_v35 }
 0x7e7   : > { %2222 = vmatpush3.bf16.msra.mxu0 %v2386_v9 }
 0x7e8   : > { %2223 = vmatprep.subr.bf16.mxu0 %v2758_v35 }
 0x7eb   : > { %2224 = vmatpush3.bf16.msra.mxu0 %v2387_v15 }
 0x7ec   : > { %2225 = vmatprep.subr.bf16.mxu0 %v2758_v35 }
 0x7ef   : > { %2226 = vmatpush3.bf16.msra.mxu0 %v2388_v0 }
 0x7f0   : > { %2227 = vmatprep.subr.bf16.mxu0 %v2758_v35 }
 0x7f3   : > { %2228 = vmatpush3.bf16.msra.mxu0 %v2389_v19 }
 0x7f4   : > { %2229 = vmatprep.subr.bf16.mxu0 %v2758_v35 }
 0x7f7   : > { %2230 = vmatpush3.bf16.msra.mxu0 %v2390_v20 }
 0x7f8   : > { %2231 = vmatprep.subr.bf16.mxu0 %v2758_v35 }
 0x7fb   : > { %2232 = vmatpush3.bf16.msra.mxu0 %v2391_v63 }
 0x7fc   : > { %2233 = vmatprep.subr.bf16.mxu0 %v2758_v35 }
 0x7ff   : > { %2234 = vmatpush3.bf16.msra.mxu0 %v2392_v36 }
 0x8b5   : > { %v1741_v61 = vpop.f32.mrb[44].mxu0  ;;  %v1782_v4 = vpop.f32.mrb[44].mxu1 }
 0x8b6   : > { %v1789_v29 = vadd.f32 %v1741_v61, %v3803_v25  ;;  %v1791_v49 = vadd.f32 %v1782_v4, %v3804_v37  ;;  %v1743_v14 = vpop.f32.mrb[45].mxu0  ;;  %v1784_v16 = vpop.f32.mrb[45].mxu1 }
 0x8b7   : > { %v1790_v52 = vadd.f32 %v1743_v14, %v3805_v1  ;;  %v1792_v50 = vadd.f32 %v1784_v16, %v3806_v46  ;;  %v1745_v51 = vpop.f32.mrb[46].mxu0  ;;  %v1786_v53 = vpop.f32.mrb[46].mxu1 }
 0x8b8   : > { %v2187_v54 = vmul.f32 -1.442695, %v1789_v29  ;;  %v1746_v56 = vpop.f32.mrb[47].mxu0  ;;  %v1787_v57 = vpop.f32.mrb[47].mxu1 }
 0x8b9   : > { %v2188_v5 = vmul.f32 -1.442695, %v1790_v52  ;;  %v2189_v13 = vmul.f32 -1.442695, %v1792_v50 }
 0x8ba   : > { %2505 = vpow2.f32 %v2187_v54 }
 0x8bb   : > { %2507 = vpow2.f32 %v2188_v5 }
 0x8bc   : > { %2509 = vpow2.f32 %v2189_v13 }
 0x8bd   : > { %2511 = vtanh.f32 %v1791_v49 }
 0x8c4   : > { %v2506_v3 = vpop.eup %2505 }
 0x8c5   : > { %v2508_v62 = vpop.eup %2507  ;;  %v1796_v18 = vadd.f32 1.0, %v2506_v3 }
 0x8c6   : > { %v1802_v17 = vadd.f32 1.0, %v2508_v62  ;;  %v2510_v47 = vpop.eup %2509 }
 0x8c7   : > { %2513 = vrcp.f32 %v1796_v18  ;;  %v2512_v48 = vpop.eup %2511  ;;  %v1809_v24 = vadd.f32 1.0, %v2510_v47 }
 0x8c8   : > { %2515 = vrcp.f32 %v1802_v17 }
 0x8c9   : > { %2517 = vrcp.f32 %v1809_v24 }
 0x8d1   : > { %v2514_v21 = vpop.eup %2513 }
 0x8d2   : > { %v2516_v22 = vpop.eup %2515  ;;  %v1813_v23 = vmul.f32 %v2514_v21, %v2512_v48 }
 0x8d3   : > { %v1812_v27 = vmul.f32 %v2516_v22, %v3648_v45  ;;  %v2518_v30 = vpop.eup %2517 }
 0x8d5   : > { %v1814_v28 = vadd.f32 %v1813_v23, %v1812_v27 }
 0x8d7   : > { %2519 = vtanh.f32 %v1814_v28 }
 0x8e1   : > { %v2520_v2 = vpop.eup %2519 }
 0x8e2   : > { %v1816_v60 = vmul.f32 %v2520_v2, %v2518_v30 }
 0x8e4   : > { %v1822_v6 = vsel %vm1821_vm3, %v1816_v60, %v3651_v32 }
 0x8e5   : > { %v1823_v26 = vpack.c.bf16 %v1822_v6, %v1822_v6 }
 0x8e7   : > { %2236 = vmatmul.mubr.bf16.vlgmr.msra.gmra.mrb[48].mxu0 %v1823_v26 }
 0x9ba   : > { %v1929_v8 = vpop.f32.mrb[48].mxu0 }
 0x9bb   : > { %v1930_v7 = vadd.f32 %v2190_v55, %v1929_v8  ;;  %v2237_v11 = vpop.f32.mrb[49].mxu0 }
 0x9bc   : > { %v1932_v10 = vpop.f32.mrb[50].mxu0 }
 0x9bd   : > { %v1935_v38 = vmax.f32 %v1930_v7, 0.0  ;;  %v2238_v39 = vpop.f32.mrb[51].mxu0 }
 0x9bf   : > { %v1943_v41 = vmul.f32 %v2199_v12, %v1935_v38 }
 0x9c1   : > { %1944 = vadd.xlane.f32.xlu0 %v1943_v41 }
 0xa4e   : > { %v1945_v43 = vpop.xlane.xlu0 %1944 }
 0xa4f   : > { %v1953_v44 = vadd.f32 %v2200_v42, %v1945_v43 }
 0xa51   : > { %v2201_v45 = vmul.f32 -1.442695, %v1953_v44 }
 0xa53   : > { %2521 = vpow2.f32 %v2201_v45 }
 0xa5d   : > { %v2522_v58 = vpop.eup %2521 }
 0xa5e   : > { %v1957_v59 = vadd.f32 1.0, %v2522_v58 }
 0xa60   : > { %2523 = vrcp.f32 %v1957_v59 }
 0xa6a   : > { %v2524_v31 = vpop.eup %2523 }
 0xa6b   : > { %1962 = vperm.xlu1 %2326, %v2524_v31  }
 0xaea   : > { %v1963_v32 = vpop.permute.xlu1 %1962 }
 0xaeb   : > { %1965 = vst [vmem:[%s408_s18] sm:$0xff] %v1963_v32 }
 0xaec   : > { %2684 = shalt.err (!%p2681_p3)
}
 0xaed   : > { %s2685_s29 = scalar_lea.hbm %s3674_s21, 128  ;;  %s2689_s9 = scalar_lea.hbm %s3807_s2, 256 }
 0xaee   : > { %p2686_p6 = scmp.ne.s32.totalorder %s3674_s21, %s2685_s29  ;;  %p2690_p7 = scmp.lt.u32.totalorder %s3674_s21, %s3807_s2 }
 0xaef   : > { %p2691_p9 = scmp.lt.u32.totalorder %s2689_s9, %s2685_s29  ;;  %p2693_p1 = scmp.lt.u32.totalorder %s2685_s29, %s3674_s21 }
 0xaf0   : > { %p2687_p8 = pnand %p2686_p6, %p3808_p4 }
 0xaf1   : > { %p2692_p10 = por %p2691_p9, %p2690_p7 }
 0xaf2   : > { %p2688_p13 = pneg %p2687_p8 }
 0xaf3   : > { %p2694_p0 = por %p2693_p1, %p2692_p10 }
 0xaf5   : > { %p2695_p2 = pnand %p2694_p0, %p2688_p13 }
 0xaf7   : > { %2698 = shalt.err (!%p2695_p2)
}
 0xaf8   : > { %2253 = dma.vmem_to_hbm [thread:$0]  (%p3808_p4), %s3669_s28, 128, %s3674_s21, %s1967_s24  }
 0xaf9 PF: > { %s3809_s23 = sld [smem:[#allocation16_spill]]  ;;  %s3810_s10 = sld [smem:[#allocation19_spill]] }
 0xafa   : > { %p3812_p11 = scmp.ge.s32.totalorder %s2745_s14, 2 }
 0xaff   : > { %s1992_s18 = sand.u32 1, %s3809_s23   ;;  %p3811_p5 = scmp.ne.s32.totalorder %s3810_s10, 0 }
 0xb00   : > { %s1993_s26 = scalar_lea.sflag [#allocation5], %s1992_s18 }
 0xb01   : > { %p2270_p12 = pnand %p3812_p11, %p3811_p5 }
 0xb03   : > { %2728 = dma.done.wait (!%p2270_p12), %s1993_s26, 128  }
 0xb04   : > { %2730 = vsyncadd (!%p2270_p12), %s1993_s26, 4294967168  ;;  %s3813_s14 = sld [smem:[#allocation17_spill]]  ;;  %s3814_s17 = sld [smem:[#allocation18_spill]] }
 0xb05   : > { %s3815_s11 = smov %s2737_s12  ;;  %s3816_s12 = smov %s2741_s13 }
 0xb0a   : > { %p26_p3 = scmp.ge.s32.totalorder %s3813_s14, 4   ;;  %s3817_s13 = smov %s3814_s17 }
 0xb0c   :  { %28 = sbr.rel (!%p26_p3) target bundleno = 10 (0xa), region = 116 }
 0xb13   :  { %1998 = vsyncpa [#allocation4], 1 }
 0xb14   :  { %2000 = vsyncpa [#allocation4 + $0x1], 1 }
 0xb15   :  { %2001 = vsyncpa [#allocation7], 1 }
 0xb16   :  { %2002 = vsyncpa [#allocation10], 1 }
 0xb17   :  { %2003 = vsyncpa [#allocation5], 1 }
 0xb18   :  { %2005 = vsyncpa [#allocation5 + $0x1], 1 }

</bundles_post_ra>
